<compile_context>
chip_gen: v7x
topology: tpu7x:2x2x1
jax: 0.10.0
libtpu: 0.0.40
codegen_flags: <defaults>
</compile_context>

<pallas_src>
import functools

import jax
import jax.numpy as jnp
import numpy as np
from jax import lax
from jax.experimental import pallas as pl
from jax.experimental.pallas import tpu as pltpu

LRELU_SLOPE = 0.2
BN_EPS = 1e-5


def _vmem_spec():
    return pl.BlockSpec(memory_space=pltpu.MemorySpace.VMEM)


# ---------------------------------------------------------------------------
# Fused forward kernel (single block; everything resident in VMEM)
# ---------------------------------------------------------------------------
def _fused_forward_kernel(x_ref, m1_ref, m2_ref, m3_ref, g_ref, bn_ref,
                          y_ref, feat_ref):
    c2 = g_ref.shape[1]                       # channels after conv2

    # --- layer 1: Conv(4->8, k4 s2 p1) + LeakyReLU(0.2) ---------------------
    z1 = jnp.dot(x_ref[...].astype(jnp.bfloat16), m1_ref[...],
                 preferred_element_type=jnp.float32)
    a1 = jnp.where(z1 >= 0, z1, LRELU_SLOPE * z1)

    # --- layer 2: Conv(8->16, k4 s2 p1) + BatchNorm(batch stats) + LeakyReLU
    z2 = jnp.dot(a1.astype(jnp.bfloat16), m2_ref[...],
                 preferred_element_type=jnp.float32)

    # Columns of z2 are (channel, oh, ow) flattened.
    n_rows = z2.shape[0]
    spatial = z2.shape[1] // c2
    inv_cnt = 1.0 / float(n_rows * spatial)   # trace-time constant

    # Two independent reductions, stacked -> ONE down-projection matmul.
    stats = jnp.concatenate(
        [jnp.sum(z2, axis=0, keepdims=True),
         jnp.sum(z2 * z2, axis=0, keepdims=True)], axis=0)          # (2, cols)
    stats_ch = jnp.dot(stats, g_ref[...],
                       preferred_element_type=jnp.float32) * inv_cnt  # (2, C)

    gt = bn_ref[0:c2, :]                      # (C, cols)  broadcast selector
    gamma_col = bn_ref[c2:c2 + 1, :]          # (1, cols)  precomputed
    shift_col = bn_ref[c2 + 1:c2 + 2, :]      # (1, cols)  precomputed (beta)

    # ONE broadcast matmul back to column space.
    stats_col = jnp.dot(stats_ch, gt, preferred_element_type=jnp.float32)  # (2, cols)
    mean_col = stats_col[0:1, :]
    var_col = stats_col[1:2, :] - mean_col * mean_col              # E[x^2]-mean^2
    scale_col = gamma_col * lax.rsqrt(var_col + BN_EPS)
    a2 = z2 * scale_col + (shift_col - mean_col * scale_col)
    feat = jnp.where(a2 >= 0, a2, LRELU_SLOPE * a2)
    feat_ref[...] = feat.astype(feat_ref.dtype)

    # --- classifier: Conv(16->latent, k4 s1 p0) over 4x4 == full dot, Sigmoid
    # m3 is zero-padded to 128 output columns -> lane-dense unmasked store.
    z3 = jnp.dot(feat, m3_ref[...], preferred_element_type=jnp.float32)
    y_ref[...] = pl.reciprocal(1.0 + jnp.exp(-z3), approx=True).astype(y_ref.dtype)


# ---------------------------------------------------------------------------
# One-time weight preprocessing (keep OUTSIDE the per-step hot path)
# ---------------------------------------------------------------------------
def _conv_as_matmul_weight(w, h_in, w_in, stride, pad):
    """Dense M of shape (Cin*Hin*Win, Cout*Hout*Wout) with NCHW (c,h,w)
    flattening on both sides: conv2d(x, w).reshape(N,-1) == x.reshape(N,-1) @ M."""
    w = np.asarray(w, np.float32)
    c_out, c_in, kh, kw = w.shape
    h_out = (h_in + 2 * pad - kh) // stride + 1
    w_out = (w_in + 2 * pad - kw) // stride + 1
    co, ci, oh, ow, ki, kj = np.meshgrid(
        np.arange(c_out), np.arange(c_in), np.arange(h_out), np.arange(w_out),
        np.arange(kh), np.arange(kw), indexing="ij")
    hi = stride * oh + ki - pad
    wi = stride * ow + kj - pad
    valid = (hi >= 0) & (hi < h_in) & (wi >= 0) & (wi < w_in)
    co, ci, oh, ow, ki, kj, hi, wi = (a[valid] for a in (co, ci, oh, ow, ki, kj, hi, wi))
    rows = (ci * h_in + hi) * w_in + wi
    cols = (co * h_out + oh) * w_out + ow
    m = np.zeros((c_in * h_in * w_in, c_out * h_out * w_out), np.float32)
    m[rows, cols] = w[co, ci, ki, kj]
    return m, h_out, w_out


def prepare_discriminator(params, input_height=16, y_lane_width=128):
    h0 = w0 = input_height
    m1, h1, w1 = _conv_as_matmul_weight(params["w1"], h0, w0, 2, 1)
    m2, h2, w2 = _conv_as_matmul_weight(params["w2"], h1, w1, 2, 1)
    c2 = params["w2"].shape[0]
    latent = params["w3"].shape[0]
    assert h2 == 4 and w2 == 4, "classifier expects a 4x4 feature map"
    spatial = h2 * w2
    cols = c2 * spatial

    # classifier k4 s1 p0 over the 4x4 map == full dot over (c, h, w);
    # zero-pad output columns to 128 for a lane-dense y store.
    m3 = np.asarray(params["w3"], np.float32).reshape(latent, cols).T
    width = max(y_lane_width, latent)
    m3_pad = np.zeros((cols, width), np.float32)
    m3_pad[:, :latent] = m3

    # 0/1 channel selector (cols, C) and its broadcast transpose, plus
    # precomputed lane-dense gamma/beta broadcast rows, packed into ONE array.
    sel = (np.arange(cols)[:, None] // spatial
           == np.arange(c2)[None, :]).astype(np.float32)            # (cols, C)
    gamma_row = np.repeat(np.asarray(params["gamma"], np.float32), spatial)[None, :]
    beta_row = np.repeat(np.asarray(params["beta"], np.float32), spatial)[None, :]
    bn_pack = np.concatenate([sel.T, gamma_row, beta_row], axis=0)   # (C+2, cols)

    return dict(
        m1=jnp.asarray(m1, jnp.bfloat16),     # bf16 weights, f32 accumulate
        m2=jnp.asarray(m2, jnp.bfloat16),
        m3=jnp.asarray(m3_pad, jnp.float32),  # (cols, 128) lane-dense
        g=jnp.asarray(sel, jnp.float32),      # (cols, C) down-projection
        bn=jnp.asarray(bn_pack, jnp.float32), # (C+2, cols) gt / gamma / beta
    )


# ---------------------------------------------------------------------------
# Forward (single fused pallas_call; only reshapes/slices outside)
# ---------------------------------------------------------------------------
@functools.partial(jax.jit, static_argnames=("latent",))
def discriminator_forward(x, prep, latent=16):
    n = x.shape[0]
    cols, c2 = prep["g"].shape
    spatial = cols // c2
    h2 = w2 = int(round(spatial ** 0.5))
    y_width = prep["m3"].shape[1]

    x_flat = x.reshape(n, -1)  # NCHW flatten == (c, h, w) column order, no transpose
    y_pad, feat_flat = pl.pallas_call(
        _fused_forward_kernel,
        out_shape=(jax.ShapeDtypeStruct((n, y_width), jnp.float32),
                   jax.ShapeDtypeStruct((n, cols), jnp.float32)),
        in_specs=[_vmem_spec()] * 6,
        out_specs=(_vmem_spec(), _vmem_spec()),
    )(x_flat, prep["m1"], prep["m2"], prep["m3"], prep["g"], prep["bn"])

    y = y_pad[:, :latent].reshape(n, latent, 1, 1)
    features = feat_flat.reshape(n, c2, h2, w2)  # already NCHW order: pure reshape
    return y, features


# ---------------------------------------------------------------------------
# Parameters (deterministic synthetic init; shapes follow the nn.Module)
# ---------------------------------------------------------------------------
def init_params(key, in_chans=4, feat=8, latent=16):
    k1, k2, k3, k4, k5 = jax.random.split(key, 5)
    return dict(
        w1=0.05 * jax.random.normal(k1, (feat, in_chans, 4, 4), jnp.float32),
        w2=0.05 * jax.random.normal(k2, (2 * feat, feat, 4, 4), jnp.float32),
        gamma=1.0 + 0.1 * jax.random.normal(k3, (2 * feat,), jnp.float32),
        beta=0.1 * jax.random.normal(k4, (2 * feat,), jnp.float32),
        w3=0.05 * jax.random.normal(k5, (latent, 2 * feat, 4, 4), jnp.float32),
    )


# ---------------------------------------------------------------------------
# Pure-JAX reference (lax conv, f32) for correctness check
# ---------------------------------------------------------------------------
def _conv_ref(x, w, stride, pad):
    return lax.conv_general_dilated(
        x, w, (stride, stride), [(pad, pad), (pad, pad)],
        dimension_numbers=("NCHW", "OIHW", "NCHW"))


def reference_forward(x, params):
    z1 = _conv_ref(x, params["w1"], 2, 1)
    a1 = jnp.where(z1 >= 0, z1, LRELU_SLOPE * z1)
    z2 = _conv_ref(a1, params["w2"], 2, 1)
    mean = jnp.mean(z2, axis=(0, 2, 3), keepdims=True)
    var = jnp.mean(jnp.square(z2 - mean), axis=(0, 2, 3), keepdims=True)
    zhat = (z2 - mean) * lax.rsqrt(var + BN_EPS)
    y2 = zhat * params["gamma"].reshape(1, -1, 1, 1) + params["beta"].reshape(1, -1, 1, 1)
    features = jnp.where(y2 >= 0, y2, LRELU_SLOPE * y2)
    logits = _conv_ref(features, params["w3"], 1, 0)
    return jax.nn.sigmoid(logits), features


if __name__ == "__main__":
    key = jax.random.PRNGKey(0)
    kx, kp = jax.random.split(key)
    # input_height=16 (multiple of 16), in_chans=4, feature_dim=8, latent=16, batch=2
    x = jax.random.normal(kx, (2, 4, 16, 16), jnp.float32)
    params = init_params(kp, in_chans=4, feat=8, latent=16)

    prep = prepare_discriminator(params, input_height=16)   # one-time preprocessing
    y, feats = discriminator_forward(x, prep, latent=16)
    jax.block_until_ready((y, feats))

    y_ref, f_ref = reference_forward(x, params)
    # bf16 conv weights / activations => ~1e-2-level expected deviation
    # (f32 reference); tolerance loosened per the perf review.
    np.testing.assert_allclose(np.asarray(feats), np.asarray(f_ref), rtol=5e-2, atol=2e-2)
    np.testing.assert_allclose(np.asarray(y), np.asarray(y_ref), rtol=5e-2, atol=2e-2)
    assert y.shape == (2, 16, 1, 1) and feats.shape == (2, 16, 4, 4)

    print("KERNEL_OK")
</pallas_src>

<mosaic_0001>
module attributes {stable_mosaic.version = 11 : i64} {
  func.func @_fused_forward_kernel(%arg0: memref<2x1024xf32, #tpu.memory_space<vmem>>, %arg1: memref<1024x512xbf16, #tpu.memory_space<vmem>>, %arg2: memref<512x256xbf16, #tpu.memory_space<vmem>>, %arg3: memref<256x128xf32, #tpu.memory_space<vmem>>, %arg4: memref<256x16xf32, #tpu.memory_space<vmem>>, %arg5: memref<18x256xf32, #tpu.memory_space<vmem>>, %arg6: memref<2x128xf32, #tpu.memory_space<vmem>>, %arg7: memref<2x256xf32, #tpu.memory_space<vmem>>) attributes {dimension_semantics = [], scalar_prefetch = 0 : i64, scratch_operands = 0 : i64, tpu.core_type = #tpu.core_type<tc>} {
    %c0 = arith.constant 0 : index
    %c0_0 = arith.constant 0 : index
    %0 = vector.load %arg0[%c0, %c0_0] : memref<2x1024xf32, #tpu.memory_space<vmem>>, vector<2x1024xf32>
    %1 = arith.truncf %0 : vector<2x1024xf32> to vector<2x1024xbf16>
    %c0_1 = arith.constant 0 : index
    %c0_2 = arith.constant 0 : index
    %2 = vector.load %arg1[%c0_1, %c0_2] : memref<1024x512xbf16, #tpu.memory_space<vmem>>, vector<1024x512xbf16>
    %cst = arith.constant dense<0.000000e+00> : vector<2x512xf32>
    %3 = tpu.matmul %1, %2, %cst {dimension_numbers = #tpu.dot_dimension_numbers<[1], [0], [0], [1], [0, 0, 1, 1], [], []>} : vector<2x1024xbf16>, vector<1024x512xbf16>, vector<2x512xf32> -> vector<2x512xf32>
    %cst_3 = arith.constant 0.000000e+00 : f32
    %4 = vector.broadcast %cst_3 : f32 to vector<2x512xf32>
    %5 = arith.cmpf oge, %3, %4 : vector<2x512xf32>
    %cst_4 = arith.constant 2.000000e-01 : f32
    %6 = vector.broadcast %cst_4 : f32 to vector<2x512xf32>
    %7 = arith.mulf %6, %3 : vector<2x512xf32>
    %8 = arith.select %5, %3, %7 : vector<2x512xi1>, vector<2x512xf32>
    %9 = arith.truncf %8 : vector<2x512xf32> to vector<2x512xbf16>
    %c0_5 = arith.constant 0 : index
    %c0_6 = arith.constant 0 : index
    %10 = vector.load %arg2[%c0_5, %c0_6] : memref<512x256xbf16, #tpu.memory_space<vmem>>, vector<512x256xbf16>
    %cst_7 = arith.constant dense<0.000000e+00> : vector<2x256xf32>
    %11 = tpu.matmul %9, %10, %cst_7 {dimension_numbers = #tpu.dot_dimension_numbers<[1], [0], [0], [1], [0, 0, 1, 1], [], []>} : vector<2x512xbf16>, vector<512x256xbf16>, vector<2x256xf32> -> vector<2x256xf32>
    %cst_8 = arith.constant dense<0.000000e+00> : vector<256xf32>
    %12 = vector.multi_reduction <add>, %11, %cst_8 [0] : vector<2x256xf32> to vector<256xf32>
    %13 = vector.shape_cast %12 : vector<256xf32> to vector<1x256xf32>
    %14 = arith.mulf %11, %11 : vector<2x256xf32>
    %cst_9 = arith.constant dense<0.000000e+00> : vector<256xf32>
    %15 = vector.multi_reduction <add>, %14, %cst_9 [0] : vector<2x256xf32> to vector<256xf32>
    %16 = vector.shape_cast %15 : vector<256xf32> to vector<1x256xf32>
    %17 = tpu.concatenate %13, %16 in 0 : vector<1x256xf32>, vector<1x256xf32> -> vector<2x256xf32>
    %c0_10 = arith.constant 0 : index
    %c0_11 = arith.constant 0 : index
    %18 = vector.load %arg4[%c0_10, %c0_11] : memref<256x16xf32, #tpu.memory_space<vmem>>, vector<256x16xf32>
    %cst_12 = arith.constant dense<0.000000e+00> : vector<2x16xf32>
    %19 = tpu.matmul %17, %18, %cst_12 {dimension_numbers = #tpu.dot_dimension_numbers<[1], [0], [0], [1], [0, 0, 1, 1], [], []>} : vector<2x256xf32>, vector<256x16xf32>, vector<2x16xf32> -> vector<2x16xf32>
    %cst_13 = arith.constant 3.125000e-02 : f32
    %20 = vector.broadcast %cst_13 : f32 to vector<2x16xf32>
    %21 = arith.mulf %19, %20 : vector<2x16xf32>
    %c0_14 = arith.constant 0 : index
    %c0_15 = arith.constant 0 : index
    %22 = vector.load %arg5[%c0_14, %c0_15] : memref<18x256xf32, #tpu.memory_space<vmem>>, vector<16x256xf32>
    %c16 = arith.constant 16 : index
    %c0_16 = arith.constant 0 : index
    %23 = vector.load %arg5[%c16, %c0_16] : memref<18x256xf32, #tpu.memory_space<vmem>>, vector<1x256xf32>
    %c17 = arith.constant 17 : index
    %c0_17 = arith.constant 0 : index
    %24 = vector.load %arg5[%c17, %c0_17] : memref<18x256xf32, #tpu.memory_space<vmem>>, vector<1x256xf32>
    %cst_18 = arith.constant dense<0.000000e+00> : vector<2x256xf32>
    %25 = tpu.matmul %21, %22, %cst_18 {dimension_numbers = #tpu.dot_dimension_numbers<[1], [0], [0], [1], [0, 0, 1, 1], [], []>} : vector<2x16xf32>, vector<16x256xf32>, vector<2x256xf32> -> vector<2x256xf32>
    %26 = vector.extract_strided_slice %25 {offsets = [0, 0], sizes = [1, 256], strides = [1, 1]} : vector<2x256xf32> to vector<1x256xf32>
    %27 = vector.extract_strided_slice %25 {offsets = [1, 0], sizes = [1, 256], strides = [1, 1]} : vector<2x256xf32> to vector<1x256xf32>
    %28 = arith.mulf %26, %26 : vector<1x256xf32>
    %29 = arith.subf %27, %28 : vector<1x256xf32>
    %cst_19 = arith.constant 9.99999974E-6 : f32
    %30 = vector.broadcast %cst_19 : f32 to vector<1x256xf32>
    %31 = arith.addf %29, %30 : vector<1x256xf32>
    %32 = math.rsqrt %31 : vector<1x256xf32>
    %33 = arith.mulf %23, %32 : vector<1x256xf32>
    %34 = vector.broadcast %33 : vector<1x256xf32> to vector<2x256xf32>
    %35 = arith.mulf %11, %34 : vector<2x256xf32>
    %36 = arith.mulf %26, %33 : vector<1x256xf32>
    %37 = arith.subf %24, %36 : vector<1x256xf32>
    %38 = vector.broadcast %37 : vector<1x256xf32> to vector<2x256xf32>
    %39 = arith.addf %35, %38 : vector<2x256xf32>
    %cst_20 = arith.constant 0.000000e+00 : f32
    %40 = vector.broadcast %cst_20 : f32 to vector<2x256xf32>
    %41 = arith.cmpf oge, %39, %40 : vector<2x256xf32>
    %cst_21 = arith.constant 2.000000e-01 : f32
    %42 = vector.broadcast %cst_21 : f32 to vector<2x256xf32>
    %43 = arith.mulf %42, %39 : vector<2x256xf32>
    %44 = arith.select %41, %39, %43 : vector<2x256xi1>, vector<2x256xf32>
    %c0_22 = arith.constant 0 : index
    %c0_23 = arith.constant 0 : index
    %45 = vector.load %arg7[%c0_22, %c0_23] : memref<2x256xf32, #tpu.memory_space<vmem>>, vector<2x256xf32>
    tpu.vector_store %arg7[%c0_22, %c0_23], %44 {strides = array<i32>} : memref<2x256xf32, #tpu.memory_space<vmem>>, vector<2x256xf32>,
    %c0_24 = arith.constant 0 : index
    %c0_25 = arith.constant 0 : index
    %46 = vector.load %arg3[%c0_24, %c0_25] : memref<256x128xf32, #tpu.memory_space<vmem>>, vector<256x128xf32>
    %cst_26 = arith.constant dense<0.000000e+00> : vector<2x128xf32>
    %47 = tpu.matmul %44, %46, %cst_26 {dimension_numbers = #tpu.dot_dimension_numbers<[1], [0], [0], [1], [0, 0, 1, 1], [], []>} : vector<2x256xf32>, vector<256x128xf32>, vector<2x128xf32> -> vector<2x128xf32>
    %cst_27 = arith.constant 0.000000e+00 : f32
    %48 = vector.broadcast %cst_27 : f32 to vector<2x128xf32>
    %49 = arith.subf %48, %47 : vector<2x128xf32>
    %50 = math.exp %49 : vector<2x128xf32>
    %cst_28 = arith.constant 1.000000e+00 : f32
    %51 = vector.broadcast %cst_28 : f32 to vector<2x128xf32>
    %52 = arith.addf %51, %50 : vector<2x128xf32>
    %53 = tpu.reciprocal %52 {approx = true} : vector<2x128xf32> -> vector<2x128xf32>
    %c0_29 = arith.constant 0 : index
    %c0_30 = arith.constant 0 : index
    %54 = vector.load %arg6[%c0_29, %c0_30] : memref<2x128xf32, #tpu.memory_space<vmem>>, vector<2x128xf32>
    tpu.vector_store %arg6[%c0_29, %c0_30], %53 {strides = array<i32>} : memref<2x128xf32, #tpu.memory_space<vmem>>, vector<2x128xf32>,
    return
  }
}

</mosaic_0001>

<bundles_post_ra>
// kernel: discriminator_forward.1
= control target key start
LH: loop header
LB: loop body
LE: loop exit
PB: predicated region body
PF: predicated region fallthrough
CT: control target
= control target key end

     0   :  { %13 = vsyncpa [#allocation3], 0  ;;  %s4320_s0 = inlined_call_operand.vmem [shape: f32[2,1024], index: 0, kind: input, shape index: {}]   ;;  %s4321_s1 = inlined_call_operand.hbm [shape: bf16[1024,512], index: 1, kind: input, shape index: {}]   ;;  %s4322_s2 = inlined_call_operand.hbm [shape: bf16[512,256], index: 2, kind: input, shape index: {}]   ;;  %s4323_s3 = inlined_call_operand.vmem [shape: f32[256,128], index: 3, kind: input, shape index: {}]   ;;  %s4324_s4 = inlined_call_operand.vmem [shape: f32[256,16], index: 4, kind: input, shape index: {}]   ;;  %s4325_s5 = inlined_call_operand.vmem [shape: f32[18,256], index: 5, kind: input, shape index: {}]   ;;  %s4326_s6 = inlined_call_operand.hbm [shape: f32[2,128], index: 6, kind: output, shape index: {0}]   ;;  %s4327_s7 = inlined_call_operand.vmem [shape: f32[2,256], index: 7, kind: output, shape index: {1}]  }
   0x1   :  { %14 = vsyncpa [#allocation6], 0 }
   0x2   :  { %15 = vsyncpa [#allocation4], 0  ;;  %s3963_s24 = smov [#allocation2]   ;;  %s3891_s28 = scalar_lea.hbm %s4321_s1, 32768 }
   0x3   :  { %s23_s25 = sshll.u32 %s3963_s24, 4  ;;  %p3892_p0 = scmp.ne.s32.totalorder %s4321_s1, %s3891_s28  ;;  %s24_s25 = int_to_ptr.vmem [resolvable:$true] %s23_s25 }
   0x4   :  { %p3895_p1 = scmp.lt.u32.totalorder %s3891_s28, %s4321_s1 }
   0x6   :  { %p3897_p2 = pnand %p3895_p1, %p3892_p0 }
   0x8   :  { %3900 = shalt.err (!%p3897_p2)
}
   0x9   :  { %s3901_s10 = scalar_lea.vmem %s24_s25, 32768  ;;  %p3906_p4 = scmp.lt.s32.totalorder %s24_s25, %s24_s25 }
   0xa   :  { %p3902_p3 = scmp.ne.s32.totalorder %s24_s25, %s3901_s10  ;;  %p3907_p5 = scmp.lt.s32.totalorder %s3901_s10, %s3901_s10 }
   0xc   :  { %p3908_p6 = por %p3907_p5, %p3906_p4 }
   0xe   :  { %p3909_p7 = pnand %p3908_p6, %p3902_p3 }
  0x10   :  { %3912 = shalt.err (!%p3909_p7)
}
  0x11   :  { %s3964_s11 = smov 256   ;;  %s3965_s12 = smov 16  }
  0x12   :  { %29 = dma.hbm_to_vmem [thread:$0]  %s4321_s1, 32768, %s24_s25, [#allocation3], %s3964_s11, %s3964_s11, %s3965_s12  }
  0x13   :  { %s3966_s15 = smov [#allocation5]   ;;  %s3913_s19 = scalar_lea.hbm %s4322_s2, 8192 }
  0x14   :  { %s35_s16 = sshll.u32 %s3966_s15, 4  ;;  %p3914_p8 = scmp.ne.s32.totalorder %s4322_s2, %s3913_s19  ;;  %s36_s16 = int_to_ptr.vmem [resolvable:$true] %s35_s16 }
  0x15   :  { %p3917_p9 = scmp.lt.u32.totalorder %s3913_s19, %s4322_s2 }
  0x17   :  { %p3919_p10 = pnand %p3917_p9, %p3914_p8 }
  0x19   :  { %3922 = shalt.err (!%p3919_p10)
}
  0x1a   :  { %s3923_s24 = scalar_lea.vmem %s36_s16, 8192  ;;  %p3928_p12 = scmp.lt.s32.totalorder %s36_s16, %s36_s16 }
  0x1b   :  { %p3924_p11 = scmp.ne.s32.totalorder %s36_s16, %s3923_s24  ;;  %p3929_p13 = scmp.lt.s32.totalorder %s3923_s24, %s3923_s24 }
  0x1d   :  { %p3930_p0 = por %p3929_p13, %p3928_p12 }
  0x1f   :  { %p3931_p1 = pnand %p3930_p0, %p3924_p11 }
  0x21   :  { %3934 = shalt.err (!%p3931_p1)
}
  0x22   :  { %s3967_s1 = smov 128   ;;  %s3968_s25 = smov 8  }
  0x23   :  { %41 = dma.hbm_to_vmem [thread:$0]  %s4322_s2, 8192, %s36_s16, [#allocation6], %s3967_s1, %s3967_s1, %s3968_s25  }
  0x24   :  { %3957 = dma.done.wait [#allocation3], 32768  }
  0x25   :  { %3958 = vsyncadd [#allocation3], 4294934528 }
  0x26   :  { %3959 = dma.done.wait [#allocation6], 8192  }
  0x27   :  { %3960 = vsyncadd [#allocation6], 4294959104  ;;  %v3401_v0 = vld [vmem:[#allocation2 + $0x4] ss:$16 sps:$4 sm:$0xff]   ;;  %v3403_v1 = vld [vmem:[#allocation2 + $0xc] ss:$16 sps:$4 sm:$0xff]   ;;  %v62_v38 = vlaneseq }
  0x28   :  { %1644 = vmatprep.subr.bf16.mxu0 %v3401_v0  ;;  %v3405_v2 = vld [vmem:[#allocation2] ss:$16 sps:$4 sm:$0xff]   ;;  %v3406_v3 = vld [vmem:[#allocation2 + $0x8] ss:$16 sps:$4 sm:$0xff]   ;;  %1808 = vmatprep.subr.bf16.mxu1 %v3403_v1  ;;  %v3407_v4 = vld [vmem:[#allocation2 + $0x24] ss:$16 sps:$4 sm:$0xff]  }
  0x29   :  { %1645 = vmatpush1.bf16.msra.mxu0 %v3405_v2  ;;  %1809 = vmatpush1.bf16.msra.mxu1 %v3406_v3  ;;  %v3409_v5 = vld [vmem:[#allocation2 + $0x2c] ss:$16 sps:$4 sm:$0xff]   ;;  %v3411_v6 = vld [vmem:[#allocation2 + $0x20] ss:$16 sps:$4 sm:$0xff]   ;;  %v3412_v7 = vld [vmem:[#allocation2 + $0x28] ss:$16 sps:$4 sm:$0xff]  }
  0x2a   :  { %1646 = vmatprep.subr.bf16.mxu0 %v3407_v4  ;;  %1810 = vmatprep.subr.bf16.mxu1 %v3409_v5  ;;  %v3413_v8 = vld [vmem:[#allocation2 + $0x44] ss:$16 sps:$4 sm:$0xff]   ;;  %v3415_v9 = vld [vmem:[#allocation2 + $0x4c] ss:$16 sps:$4 sm:$0xff]   ;;  %v3417_v10 = vld [vmem:[#allocation2 + $0x40] ss:$16 sps:$4 sm:$0xff]  }
  0x2b   :  { %v3418_v11 = vld [vmem:[#allocation2 + $0x48] ss:$16 sps:$4 sm:$0xff]   ;;  %v3419_v12 = vld [vmem:[#allocation2 + $0x64] ss:$16 sps:$4 sm:$0xff]   ;;  %v3421_v13 = vld [vmem:[#allocation2 + $0x6c] ss:$16 sps:$4 sm:$0xff]  }
  0x2c   :  { %v3423_v14 = vld [vmem:[#allocation2 + $0x60] ss:$16 sps:$4 sm:$0xff]   ;;  %v3424_v15 = vld [vmem:[#allocation2 + $0x68] ss:$16 sps:$4 sm:$0xff]   ;;  %v3425_v16 = vld [vmem:[#allocation2 + $0x84] ss:$16 sps:$4 sm:$0xff]  }
  0x2d   :  { %1647 = vmatpush1.bf16.msra.mxu0 %v3411_v6  ;;  %1811 = vmatpush1.bf16.msra.mxu1 %v3412_v7  ;;  %v3427_v17 = vld [vmem:[#allocation2 + $0x8c] ss:$16 sps:$4 sm:$0xff]   ;;  %v3429_v18 = vld [vmem:[#allocation2 + $0x80] ss:$16 sps:$4 sm:$0xff]   ;;  %v3430_v19 = vld [vmem:[#allocation2 + $0x88] ss:$16 sps:$4 sm:$0xff]  }
  0x2e   :  { %1648 = vmatprep.subr.bf16.mxu0 %v3413_v8  ;;  %1812 = vmatprep.subr.bf16.mxu1 %v3415_v9  ;;  %v3431_v20 = vld [vmem:[#allocation2 + $0xa4] ss:$16 sps:$4 sm:$0xff]   ;;  %v3433_v21 = vld [vmem:[#allocation2 + $0xac] ss:$16 sps:$4 sm:$0xff]   ;;  %v3435_v22 = vld [vmem:[#allocation2 + $0xa0] ss:$16 sps:$4 sm:$0xff]  }
  0x2f   :  { %v3436_v23 = vld [vmem:[#allocation2 + $0xa8] ss:$16 sps:$4 sm:$0xff]   ;;  %v3437_v24 = vld [vmem:[#allocation2 + $0xc4] ss:$16 sps:$4 sm:$0xff]   ;;  %v3439_v25 = vld [vmem:[#allocation2 + $0xcc] ss:$16 sps:$4 sm:$0xff]  }
  0x30   :  { %v3441_v26 = vld [vmem:[#allocation2 + $0xc0] ss:$16 sps:$4 sm:$0xff]   ;;  %v3442_v27 = vld [vmem:[#allocation2 + $0xc8] ss:$16 sps:$4 sm:$0xff]   ;;  %v3443_v28 = vld [vmem:[#allocation2 + $0xe4] ss:$16 sps:$4 sm:$0xff]  }
  0x31   :  { %1649 = vmatpush1.bf16.msra.mxu0 %v3417_v10  ;;  %1813 = vmatpush1.bf16.msra.mxu1 %v3418_v11  ;;  %v3445_v29 = vld [vmem:[#allocation2 + $0xec] ss:$16 sps:$4 sm:$0xff]   ;;  %v3447_v30 = vld [vmem:[#allocation2 + $0xe0] ss:$16 sps:$4 sm:$0xff]   ;;  %v3448_v31 = vld [vmem:[#allocation2 + $0xe8] ss:$16 sps:$4 sm:$0xff]  }
  0x32   :  { %1650 = vmatprep.subr.bf16.mxu0 %v3419_v12  ;;  %1814 = vmatprep.subr.bf16.mxu1 %v3421_v13  ;;  %v3449_v32 = vld [vmem:[#allocation2 + $0x104] ss:$16 sps:$4 sm:$0xff]   ;;  %v3451_v33 = vld [vmem:[#allocation2 + $0x10c] ss:$16 sps:$4 sm:$0xff]   ;;  %v3453_v34 = vld [vmem:[#allocation2 + $0x100] ss:$16 sps:$4 sm:$0xff]  }
  0x33   :  { %v3454_v35 = vld [vmem:[#allocation2 + $0x108] ss:$16 sps:$4 sm:$0xff]   ;;  %v3969_v36 = vmov 1983009808   ;;  %v3455_v39 = vld [vmem:[#allocation2 + $0x124] ss:$16 sps:$4 sm:$0xff]  }
  0x34   :  { %v60_v37 = vunpack.c.l.s4 %v3969_v36  ;;  %v3457_v40 = vld [vmem:[#allocation2 + $0x12c] ss:$16 sps:$4 sm:$0xff]   ;;  %v3459_v41 = vld [vmem:[#allocation2 + $0x120] ss:$16 sps:$4 sm:$0xff]   ;;  %v4037_v43 = vshrl.u32 %v62_v38, 7  ;;  %vm2454_vm4 = vcmask 1041408  }
  0x35   :  { %1651 = vmatpush1.bf16.msra.mxu0 %v3423_v14  ;;  %1815 = vmatpush1.bf16.msra.mxu1 %v3424_v15  ;;  %v3460_v44 = vld [vmem:[#allocation2 + $0x128] ss:$16 sps:$4 sm:$0xff]   ;;  %v3461_v45 = vld [vmem:[#allocation2 + $0x144] ss:$16 sps:$4 sm:$0xff]   ;;  %v3463_v46 = vld [vmem:[#allocation2 + $0x14c] ss:$16 sps:$4 sm:$0xff]  }
  0x36   :  { %1652 = vmatprep.subr.bf16.mxu0 %v3425_v16  ;;  %1816 = vmatprep.subr.bf16.mxu1 %v3427_v17  ;;  %v61_v42 = vunpack.c.0.s8 %v60_v37  ;;  %v3465_v47 = vld [vmem:[#allocation2 + $0x140] ss:$16 sps:$4 sm:$0xff]   ;;  %v3466_v48 = vld [vmem:[#allocation2 + $0x148] ss:$16 sps:$4 sm:$0xff]   ;;  %v3467_v50 = vld [vmem:[#allocation2 + $0x164] ss:$16 sps:$4 sm:$0xff]  }
  0x37   :  { %v3469_v51 = vld [vmem:[#allocation2 + $0x16c] ss:$16 sps:$4 sm:$0xff]   ;;  %v54_v52 = vld [vmem:[%s4320_s0] sm:$0xff]  ;;  %v3472_v55 = vld [vmem:[#allocation2 + $0x168] ss:$16 sps:$4 sm:$0xff]   ;;  %vm2485_vm5 = vcmask 1040384  }
  0x38   :  { %v4040_v49 = vsub.s32 %v61_v42, %v4037_v43  ;;  %v3471_v53 = vld [vmem:[#allocation2 + $0x160] ss:$16 sps:$4 sm:$0xff]   ;;  %v3473_v56 = vld [vmem:[#allocation2 + $0x184] ss:$16 sps:$4 sm:$0xff]   ;;  %v3475_v57 = vld [vmem:[#allocation2 + $0x18c] ss:$16 sps:$4 sm:$0xff]   ;;  %v58_v4 = vcombine.high %v54_v52, %v54_v52 }
  0x39   :  { %1653 = vmatpush1.bf16.msra.mxu0 %v3429_v18  ;;  %1817 = vmatpush1.bf16.msra.mxu1 %v3430_v19  ;;  %v3477_v59 = vld [vmem:[#allocation2 + $0x180] ss:$16 sps:$4 sm:$0xff]   ;;  %v3478_v61 = vld [vmem:[#allocation2 + $0x188] ss:$16 sps:$4 sm:$0xff]   ;;  %v3479_v62 = vld [vmem:[#allocation2 + $0x1a4] ss:$16 sps:$4 sm:$0xff]  }
  0x3a   :  { %1654 = vmatprep.subr.bf16.mxu0 %v3431_v20  ;;  %1818 = vmatprep.subr.bf16.mxu1 %v3433_v21  ;;  %v65_v54 = vrot.slane %v54_v52, %v4040_v49  ;;  %v3481_v63 = vld [vmem:[#allocation2 + $0x1ac] ss:$16 sps:$4 sm:$0xff]   ;;  %v3483_v0 = vld [vmem:[#allocation2 + $0x1a0] ss:$16 sps:$4 sm:$0xff]   ;;  %v3484_v1 = vld [vmem:[#allocation2 + $0x1a8] ss:$16 sps:$4 sm:$0xff]   ;;  %v4047_v9 = vrot.slane %v58_v4, %v4040_v49 }
  0x3b   :  { %v3485_v2 = vld [vmem:[#allocation2 + $0x1c4] ss:$16 sps:$4 sm:$0xff]   ;;  %v3487_v3 = vld [vmem:[#allocation2 + $0x1cc] ss:$16 sps:$4 sm:$0xff]   ;;  %v3489_v5 = vld [vmem:[#allocation2 + $0x1c0] ss:$16 sps:$4 sm:$0xff]  }
  0x3c   :  { %v73_v58 = vcombine.high %v65_v54, %v65_v54  ;;  %v3490_v6 = vld [vmem:[#allocation2 + $0x1c8] ss:$16 sps:$4 sm:$0xff]   ;;  %v3491_v7 = vld [vmem:[#allocation2 + $0x1e4] ss:$16 sps:$4 sm:$0xff]   ;;  %v3493_v8 = vld [vmem:[#allocation2 + $0x1ec] ss:$16 sps:$4 sm:$0xff]   ;;  %v74_v14 = vcombine.high %v4047_v9, %v4047_v9  ;;  %v100_v16 = vpack.c.bf16 %v65_v54, %v65_v54 }
  0x3d   :  { %1655 = vmatpush1.bf16.msra.mxu0 %v3435_v22  ;;  %1819 = vmatpush1.bf16.msra.mxu1 %v3436_v23  ;;  %v3495_v10 = vld [vmem:[#allocation2 + $0x1e0] ss:$16 sps:$4 sm:$0xff]   ;;  %v3496_v11 = vld [vmem:[#allocation2 + $0x1e8] ss:$16 sps:$4 sm:$0xff]   ;;  %v3500_v12 = vld [vmem:[#allocation2 + $0x204] ss:$16 sps:$4 sm:$0xff]  }
  0x3e   :  { %1656 = vmatprep.subr.bf16.mxu0 %v3437_v24  ;;  %1820 = vmatprep.subr.bf16.mxu1 %v3439_v25  ;;  %v101_v60 = vpack.c.bf16 %v73_v58, %v73_v58  ;;  %v3503_v13 = vld [vmem:[#allocation2 + $0x20c] ss:$16 sps:$4 sm:$0xff]   ;;  %v3498_v15 = vld [vmem:[#allocation2 + $0x200] ss:$16 sps:$4 sm:$0xff]   ;;  %v3501_v17 = vld [vmem:[#allocation2 + $0x208] ss:$16 sps:$4 sm:$0xff]   ;;  %v103_v20 = vpack.c.bf16 %v74_v14, %v74_v14 }
  0x3f   :  { %v3506_v18 = vld [vmem:[#allocation2 + $0x224] ss:$16 sps:$4 sm:$0xff]   ;;  %v3509_v19 = vld [vmem:[#allocation2 + $0x22c] ss:$16 sps:$4 sm:$0xff]   ;;  %v3504_v21 = vld [vmem:[#allocation2 + $0x220] ss:$16 sps:$4 sm:$0xff]  }
  0x40   :  { %1676 = vmatprep.mubr.bf16.mxu0 %v101_v60  ;;  %1840 = vmatprep.mubr.bf16.mxu1 %v101_v60  ;;  %v3507_v22 = vld [vmem:[#allocation2 + $0x228] ss:$16 sps:$4 sm:$0xff]   ;;  %v3512_v23 = vld [vmem:[#allocation2 + $0x244] ss:$16 sps:$4 sm:$0xff]   ;;  %v3515_v24 = vld [vmem:[#allocation2 + $0x24c] ss:$16 sps:$4 sm:$0xff]  }
  0x41   :  { %1657 = vmatpush1.bf16.msra.mxu0 %v3441_v26  ;;  %1821 = vmatpush1.bf16.msra.mxu1 %v3442_v27  ;;  %v3510_v25 = vld [vmem:[#allocation2 + $0x240] ss:$16 sps:$4 sm:$0xff]   ;;  %v3513_v26 = vld [vmem:[#allocation2 + $0x248] ss:$16 sps:$4 sm:$0xff]   ;;  %v3518_v27 = vld [vmem:[#allocation2 + $0x264] ss:$16 sps:$4 sm:$0xff]  }
  0x42   :  { %1658 = vmatprep.subr.bf16.mxu0 %v3443_v28  ;;  %1822 = vmatprep.subr.bf16.mxu1 %v3445_v29  ;;  %v3521_v28 = vld [vmem:[#allocation2 + $0x26c] ss:$16 sps:$4 sm:$0xff]   ;;  %v3516_v29 = vld [vmem:[#allocation2 + $0x260] ss:$16 sps:$4 sm:$0xff]   ;;  %v3531_v38 = vld [vmem:[#allocation2 + $0x2a8] ss:$16 sps:$4 sm:$0xff]  }
  0x43   :  { %v3533_v36 = vld [vmem:[#allocation2 + $0x2ac] ss:$16 sps:$4 sm:$0xff]   ;;  %v3528_v37 = vld [vmem:[#allocation2 + $0x2a0] ss:$16 sps:$4 sm:$0xff]   ;;  %v3537_v42 = vld [vmem:[#allocation2 + $0x2c8] ss:$16 sps:$4 sm:$0xff]  }
  0x44   :  { %v3549_v52 = vld [vmem:[#allocation2 + $0x308] ss:$16 sps:$4 sm:$0xff]   ;;  %v3557_v54 = vld [vmem:[#allocation2 + $0x32c] ss:$16 sps:$4 sm:$0xff]   ;;  %v3590_v14 = vld [vmem:[#allocation2 + $0x3e4] ss:$16 sps:$4 sm:$0xff]  }
  0x45   :  { %1659 = vmatpush1.bf16.msra.mxu0 %v3447_v30  ;;  %1823 = vmatpush1.bf16.msra.mxu1 %v3448_v31  ;;  %v3519_v30 = vld [vmem:[#allocation2 + $0x268] ss:$16 sps:$4 sm:$0xff]   ;;  %v3524_v31 = vld [vmem:[#allocation2 + $0x284] ss:$16 sps:$4 sm:$0xff]   ;;  %v3563_v58 = vld [vmem:[#allocation2 + $0x34c] ss:$16 sps:$4 sm:$0xff]  }
  0x46   :  { %1660 = vmatprep.subr.bf16.mxu0 %v3449_v32  ;;  %1824 = vmatprep.subr.bf16.mxu1 %v3451_v33  ;;  %v3527_v32 = vld [vmem:[#allocation2 + $0x28c] ss:$16 sps:$4 sm:$0xff]   ;;  %v3522_v33 = vld [vmem:[#allocation2 + $0x280] ss:$16 sps:$4 sm:$0xff]   ;;  %v3561_v60 = vld [vmem:[#allocation2 + $0x348] ss:$16 sps:$4 sm:$0xff]  }
  0x47   :  { %v3573_v4 = vld [vmem:[#allocation2 + $0x388] ss:$16 sps:$4 sm:$0xff]   ;;  %vm2599_vm6 = vcmask 130048  }
  0x49   :  { %1661 = vmatpush1.bf16.msra.mxu0 %v3453_v34  ;;  %1825 = vmatpush1.bf16.msra.mxu1 %v3454_v35  ;;  %v3525_v34 = vld [vmem:[#allocation2 + $0x288] ss:$16 sps:$4 sm:$0xff]   ;;  %v3530_v35 = vld [vmem:[#allocation2 + $0x2a4] ss:$16 sps:$4 sm:$0xff]  }
  0x4a   :  { %1662 = vmatprep.subr.bf16.mxu0 %v3455_v39  ;;  %1826 = vmatprep.subr.bf16.mxu1 %v3457_v40  ;;  %v3536_v39 = vld [vmem:[#allocation2 + $0x2c4] ss:$16 sps:$4 sm:$0xff]   ;;  %v3539_v40 = vld [vmem:[#allocation2 + $0x2cc] ss:$16 sps:$4 sm:$0xff]  }
  0x4d   :  { %1663 = vmatpush1.bf16.msra.mxu0 %v3459_v41  ;;  %1827 = vmatpush1.bf16.msra.mxu1 %v3460_v44  ;;  %v3534_v41 = vld [vmem:[#allocation2 + $0x2c0] ss:$16 sps:$4 sm:$0xff]   ;;  %v3542_v44 = vld [vmem:[#allocation2 + $0x2e4] ss:$16 sps:$4 sm:$0xff]  }
  0x4e   :  { %1664 = vmatprep.subr.bf16.mxu0 %v3461_v45  ;;  %1828 = vmatprep.subr.bf16.mxu1 %v3463_v46  ;;  %v3545_v45 = vld [vmem:[#allocation2 + $0x2ec] ss:$16 sps:$4 sm:$0xff]   ;;  %v3540_v46 = vld [vmem:[#allocation2 + $0x2e0] ss:$16 sps:$4 sm:$0xff]  }
  0x51   :  { %1665 = vmatpush1.bf16.msra.mxu0 %v3465_v47  ;;  %1829 = vmatpush1.bf16.msra.mxu1 %v3466_v48  ;;  %v3543_v47 = vld [vmem:[#allocation2 + $0x2e8] ss:$16 sps:$4 sm:$0xff]   ;;  %v3548_v48 = vld [vmem:[#allocation2 + $0x304] ss:$16 sps:$4 sm:$0xff]  }
  0x52   :  { %1666 = vmatprep.subr.bf16.mxu0 %v3467_v50  ;;  %1830 = vmatprep.subr.bf16.mxu1 %v3469_v51  ;;  %v3551_v50 = vld [vmem:[#allocation2 + $0x30c] ss:$16 sps:$4 sm:$0xff]   ;;  %v3546_v51 = vld [vmem:[#allocation2 + $0x300] ss:$16 sps:$4 sm:$0xff]  }
  0x55   :  { %1667 = vmatpush1.bf16.msra.mxu0 %v3471_v53  ;;  %1831 = vmatpush1.bf16.msra.mxu1 %v3472_v55  ;;  %v3554_v53 = vld [vmem:[#allocation2 + $0x324] ss:$16 sps:$4 sm:$0xff]   ;;  %v3552_v55 = vld [vmem:[#allocation2 + $0x320] ss:$16 sps:$4 sm:$0xff]  }
  0x56   :  { %1668 = vmatprep.subr.bf16.mxu0 %v3473_v56  ;;  %1832 = vmatprep.subr.bf16.mxu1 %v3475_v57  ;;  %v3555_v56 = vld [vmem:[#allocation2 + $0x328] ss:$16 sps:$4 sm:$0xff]   ;;  %v3560_v57 = vld [vmem:[#allocation2 + $0x344] ss:$16 sps:$4 sm:$0xff]  }
  0x59   :  { %1669 = vmatpush1.bf16.msra.mxu0 %v3477_v59  ;;  %1833 = vmatpush1.bf16.msra.mxu1 %v3478_v61  ;;  %v3558_v59 = vld [vmem:[#allocation2 + $0x340] ss:$16 sps:$4 sm:$0xff]   ;;  %v3566_v61 = vld [vmem:[#allocation2 + $0x364] ss:$16 sps:$4 sm:$0xff]  }
  0x5a   :  { %1670 = vmatprep.subr.bf16.mxu0 %v3479_v62  ;;  %1834 = vmatprep.subr.bf16.mxu1 %v3481_v63  ;;  %v3569_v62 = vld [vmem:[#allocation2 + $0x36c] ss:$16 sps:$4 sm:$0xff]   ;;  %v3564_v63 = vld [vmem:[#allocation2 + $0x360] ss:$16 sps:$4 sm:$0xff]  }
  0x5d   :  { %1671 = vmatpush1.bf16.msra.mxu0 %v3483_v0  ;;  %1835 = vmatpush1.bf16.msra.mxu1 %v3484_v1  ;;  %v3567_v0 = vld [vmem:[#allocation2 + $0x368] ss:$16 sps:$4 sm:$0xff]   ;;  %v3572_v1 = vld [vmem:[#allocation2 + $0x384] ss:$16 sps:$4 sm:$0xff]  }
  0x5e   :  { %1672 = vmatprep.subr.bf16.mxu0 %v3485_v2  ;;  %1836 = vmatprep.subr.bf16.mxu1 %v3487_v3  ;;  %v3575_v2 = vld [vmem:[#allocation2 + $0x38c] ss:$16 sps:$4 sm:$0xff]   ;;  %v3570_v3 = vld [vmem:[#allocation2 + $0x380] ss:$16 sps:$4 sm:$0xff]  }
  0x61   :  { %1673 = vmatpush1.bf16.msra.mxu0 %v3489_v5  ;;  %1837 = vmatpush1.bf16.msra.mxu1 %v3490_v6  ;;  %v3578_v5 = vld [vmem:[#allocation2 + $0x3a4] ss:$16 sps:$4 sm:$0xff]   ;;  %v3581_v6 = vld [vmem:[#allocation2 + $0x3ac] ss:$16 sps:$4 sm:$0xff]  }
  0x62   :  { %1674 = vmatprep.subr.bf16.mxu0 %v3491_v7  ;;  %1838 = vmatprep.subr.bf16.mxu1 %v3493_v8  ;;  %v3576_v7 = vld [vmem:[#allocation2 + $0x3a0] ss:$16 sps:$4 sm:$0xff]   ;;  %v3579_v8 = vld [vmem:[#allocation2 + $0x3a8] ss:$16 sps:$4 sm:$0xff]  }
  0x65   :  { %1675 = vmatpush1.bf16.msra.mxu0 %v3495_v10  ;;  %1839 = vmatpush1.bf16.msra.mxu1 %v3496_v11  ;;  %v3584_v10 = vld [vmem:[#allocation2 + $0x3c4] ss:$16 sps:$4 sm:$0xff]   ;;  %v3587_v11 = vld [vmem:[#allocation2 + $0x3cc] ss:$16 sps:$4 sm:$0xff]  }
  0x66   :  { %1685 = vmatprep.subr.bf16.mxu0 %v3500_v12  ;;  %1849 = vmatprep.subr.bf16.mxu1 %v3503_v13  ;;  %v3582_v12 = vld [vmem:[#allocation2 + $0x3c0] ss:$16 sps:$4 sm:$0xff]   ;;  %v3585_v13 = vld [vmem:[#allocation2 + $0x3c8] ss:$16 sps:$4 sm:$0xff]  }
  0x68   :  { %1677 = vmatmul.mubr.bf16.vlgmr.msra.gmra.mrb[0].mxu0 %v100_v16  ;;  %1841 = vmatmul.mubr.bf16.vlgmr.msra.gmra.mrb[0].mxu1 %v100_v16  ;;  %v3588_v16 = vld [vmem:[#allocation2 + $0x3e0] ss:$16 sps:$4 sm:$0xff]  }
  0x69   :  { %1686 = vmatpush1.bf16.msra.mxu0 %v3498_v15  ;;  %1850 = vmatpush1.bf16.msra.mxu1 %v3501_v17  ;;  %v3593_v15 = vld [vmem:[#allocation2 + $0x3ec] ss:$16 sps:$4 sm:$0xff]   ;;  %v3591_v17 = vld [vmem:[#allocation2 + $0x3e8] ss:$16 sps:$4 sm:$0xff]  }
  0x6a   :  { %1687 = vmatprep.subr.bf16.mxu0 %v3506_v18  ;;  %1851 = vmatprep.subr.bf16.mxu1 %v3509_v19  ;;  %v3596_v18 = vld [vmem:[#allocation2 + $0x404] ss:$16 sps:$4 sm:$0xff]   ;;  %v3599_v19 = vld [vmem:[#allocation2 + $0x40c] ss:$16 sps:$4 sm:$0xff]  }
  0x6b   :  { %1717 = vmatprep.mubr.bf16.mxu0 %v103_v20  ;;  %1881 = vmatprep.mubr.bf16.mxu1 %v103_v20  ;;  %v3594_v20 = vld [vmem:[#allocation2 + $0x400] ss:$16 sps:$4 sm:$0xff]  }
  0x6d   :  { %1688 = vmatpush1.bf16.msra.mxu0 %v3504_v21  ;;  %1852 = vmatpush1.bf16.msra.mxu1 %v3507_v22  ;;  %v102_v21 = vpack.c.bf16 %v4047_v9, %v4047_v9  ;;  %v3597_v22 = vld [vmem:[#allocation2 + $0x408] ss:$16 sps:$4 sm:$0xff]  }
  0x6e   :  { %1689 = vmatprep.subr.bf16.mxu0 %v3512_v23  ;;  %1853 = vmatprep.subr.bf16.mxu1 %v3515_v24  ;;  %v4056_v23 = vld [vmem:[%s4320_s0 + $0x8] sm:$0xff]  ;;  %v3602_v24 = vld [vmem:[#allocation2 + $0x424] ss:$16 sps:$4 sm:$0xff]  }
  0x71   :  { %1690 = vmatpush1.bf16.msra.mxu0 %v3510_v25  ;;  %1854 = vmatpush1.bf16.msra.mxu1 %v3513_v26  ;;  %v3605_v25 = vld [vmem:[#allocation2 + $0x42c] ss:$16 sps:$4 sm:$0xff]   ;;  %v4060_v26 = vrot.slane %v4056_v23, %v4040_v49 }
  0x72   :  { %1691 = vmatprep.subr.bf16.mxu0 %v3518_v27  ;;  %1855 = vmatprep.subr.bf16.mxu1 %v3521_v28  ;;  %v3600_v27 = vld [vmem:[#allocation2 + $0x420] ss:$16 sps:$4 sm:$0xff]   ;;  %v3603_v28 = vld [vmem:[#allocation2 + $0x428] ss:$16 sps:$4 sm:$0xff]  }
  0x73   :  { %v90_v9 = vcombine.high %v4060_v26, %v4060_v26 }
  0x75   :  { %1692 = vmatpush1.bf16.msra.mxu0 %v3516_v29  ;;  %1856 = vmatpush1.bf16.msra.mxu1 %v3519_v30  ;;  %v3608_v29 = vld [vmem:[#allocation2 + $0x444] ss:$16 sps:$4 sm:$0xff]   ;;  %v3611_v30 = vld [vmem:[#allocation2 + $0x44c] ss:$16 sps:$4 sm:$0xff]  }
  0x76   :  { %1693 = vmatprep.subr.bf16.mxu0 %v3524_v31  ;;  %1857 = vmatprep.subr.bf16.mxu1 %v3527_v32  ;;  %v105_v31 = vpack.c.bf16 %v90_v9, %v90_v9  ;;  %v3606_v32 = vld [vmem:[#allocation2 + $0x440] ss:$16 sps:$4 sm:$0xff]  }
  0x77   :  { %v3684_v9 = vld [vmem:[#allocation2 + $0x5e0] ss:$16 sps:$4 sm:$0xff]  }
  0x79   :  { %1694 = vmatpush1.bf16.msra.mxu0 %v3522_v33  ;;  %1858 = vmatpush1.bf16.msra.mxu1 %v3525_v34  ;;  %v3609_v33 = vld [vmem:[#allocation2 + $0x448] ss:$16 sps:$4 sm:$0xff]   ;;  %v3614_v34 = vld [vmem:[#allocation2 + $0x464] ss:$16 sps:$4 sm:$0xff]  }
  0x7a   :  { %1695 = vmatprep.subr.bf16.mxu0 %v3530_v35  ;;  %1859 = vmatprep.subr.bf16.mxu1 %v3533_v36  ;;  %v3617_v35 = vld [vmem:[#allocation2 + $0x46c] ss:$16 sps:$4 sm:$0xff]   ;;  %v3612_v36 = vld [vmem:[#allocation2 + $0x460] ss:$16 sps:$4 sm:$0xff]  }
  0x7d   :  { %1696 = vmatpush1.bf16.msra.mxu0 %v3528_v37  ;;  %1860 = vmatpush1.bf16.msra.mxu1 %v3531_v38  ;;  %v3615_v37 = vld [vmem:[#allocation2 + $0x468] ss:$16 sps:$4 sm:$0xff]   ;;  %v3620_v38 = vld [vmem:[#allocation2 + $0x484] ss:$16 sps:$4 sm:$0xff]  }
  0x7e   :  { %1697 = vmatprep.subr.bf16.mxu0 %v3536_v39  ;;  %1861 = vmatprep.subr.bf16.mxu1 %v3539_v40  ;;  %v3623_v39 = vld [vmem:[#allocation2 + $0x48c] ss:$16 sps:$4 sm:$0xff]   ;;  %v3618_v40 = vld [vmem:[#allocation2 + $0x480] ss:$16 sps:$4 sm:$0xff]  }
  0x81   :  { %1698 = vmatpush1.bf16.msra.mxu0 %v3534_v41  ;;  %1862 = vmatpush1.bf16.msra.mxu1 %v3537_v42  ;;  %v3621_v41 = vld [vmem:[#allocation2 + $0x488] ss:$16 sps:$4 sm:$0xff]   ;;  %v3626_v42 = vld [vmem:[#allocation2 + $0x4a4] ss:$16 sps:$4 sm:$0xff]  }
  0x82   :  { %1699 = vmatprep.subr.bf16.mxu0 %v3542_v44  ;;  %1863 = vmatprep.subr.bf16.mxu1 %v3545_v45  ;;  %v3629_v44 = vld [vmem:[#allocation2 + $0x4ac] ss:$16 sps:$4 sm:$0xff]   ;;  %v3624_v45 = vld [vmem:[#allocation2 + $0x4a0] ss:$16 sps:$4 sm:$0xff]  }
  0x85   :  { %1700 = vmatpush1.bf16.msra.mxu0 %v3540_v46  ;;  %1864 = vmatpush1.bf16.msra.mxu1 %v3543_v47  ;;  %v3627_v46 = vld [vmem:[#allocation2 + $0x4a8] ss:$16 sps:$4 sm:$0xff]   ;;  %v3632_v47 = vld [vmem:[#allocation2 + $0x4c4] ss:$16 sps:$4 sm:$0xff]  }
  0x86   :  { %1701 = vmatprep.subr.bf16.mxu0 %v3548_v48  ;;  %1865 = vmatprep.subr.bf16.mxu1 %v3551_v50  ;;  %v3635_v48 = vld [vmem:[#allocation2 + $0x4cc] ss:$16 sps:$4 sm:$0xff]   ;;  %v3630_v50 = vld [vmem:[#allocation2 + $0x4c0] ss:$16 sps:$4 sm:$0xff]  }
  0x89   :  { %1702 = vmatpush1.bf16.msra.mxu0 %v3546_v51  ;;  %1866 = vmatpush1.bf16.msra.mxu1 %v3549_v52  ;;  %v3633_v51 = vld [vmem:[#allocation2 + $0x4c8] ss:$16 sps:$4 sm:$0xff]   ;;  %v3638_v52 = vld [vmem:[#allocation2 + $0x4e4] ss:$16 sps:$4 sm:$0xff]  }
  0x8a   :  { %1703 = vmatprep.subr.bf16.mxu0 %v3554_v53  ;;  %1867 = vmatprep.subr.bf16.mxu1 %v3557_v54  ;;  %v3641_v53 = vld [vmem:[#allocation2 + $0x4ec] ss:$16 sps:$4 sm:$0xff]   ;;  %v3636_v54 = vld [vmem:[#allocation2 + $0x4e0] ss:$16 sps:$4 sm:$0xff]  }
  0x8d   :  { %1704 = vmatpush1.bf16.msra.mxu0 %v3552_v55  ;;  %1868 = vmatpush1.bf16.msra.mxu1 %v3555_v56  ;;  %v3639_v55 = vld [vmem:[#allocation2 + $0x4e8] ss:$16 sps:$4 sm:$0xff]   ;;  %v3644_v56 = vld [vmem:[#allocation2 + $0x504] ss:$16 sps:$4 sm:$0xff]  }
  0x8e   :  { %1705 = vmatprep.subr.bf16.mxu0 %v3560_v57  ;;  %1869 = vmatprep.subr.bf16.mxu1 %v3563_v58  ;;  %v3647_v57 = vld [vmem:[#allocation2 + $0x50c] ss:$16 sps:$4 sm:$0xff]   ;;  %v3642_v58 = vld [vmem:[#allocation2 + $0x500] ss:$16 sps:$4 sm:$0xff]  }
  0x91   :  { %1706 = vmatpush1.bf16.msra.mxu0 %v3558_v59  ;;  %1870 = vmatpush1.bf16.msra.mxu1 %v3561_v60  ;;  %v3645_v59 = vld [vmem:[#allocation2 + $0x508] ss:$16 sps:$4 sm:$0xff]   ;;  %v3650_v60 = vld [vmem:[#allocation2 + $0x524] ss:$16 sps:$4 sm:$0xff]  }
  0x92   :  { %1707 = vmatprep.subr.bf16.mxu0 %v3566_v61  ;;  %1871 = vmatprep.subr.bf16.mxu1 %v3569_v62  ;;  %v3653_v61 = vld [vmem:[#allocation2 + $0x52c] ss:$16 sps:$4 sm:$0xff]   ;;  %v3648_v62 = vld [vmem:[#allocation2 + $0x520] ss:$16 sps:$4 sm:$0xff]  }
  0x95   :  { %1708 = vmatpush1.bf16.msra.mxu0 %v3564_v63  ;;  %1872 = vmatpush1.bf16.msra.mxu1 %v3567_v0  ;;  %v3651_v63 = vld [vmem:[#allocation2 + $0x528] ss:$16 sps:$4 sm:$0xff]   ;;  %v3656_v0 = vld [vmem:[#allocation2 + $0x544] ss:$16 sps:$4 sm:$0xff]  }
  0x96   :  { %1709 = vmatprep.subr.bf16.mxu0 %v3572_v1  ;;  %1873 = vmatprep.subr.bf16.mxu1 %v3575_v2  ;;  %v3659_v1 = vld [vmem:[#allocation2 + $0x54c] ss:$16 sps:$4 sm:$0xff]   ;;  %v3654_v2 = vld [vmem:[#allocation2 + $0x540] ss:$16 sps:$4 sm:$0xff]  }
  0x99   :  { %1710 = vmatpush1.bf16.msra.mxu0 %v3570_v3  ;;  %1874 = vmatpush1.bf16.msra.mxu1 %v3573_v4  ;;  %v3657_v3 = vld [vmem:[#allocation2 + $0x548] ss:$16 sps:$4 sm:$0xff]   ;;  %v3662_v4 = vld [vmem:[#allocation2 + $0x564] ss:$16 sps:$4 sm:$0xff]  }
  0x9a   :  { %1711 = vmatprep.subr.bf16.mxu0 %v3578_v5  ;;  %1875 = vmatprep.subr.bf16.mxu1 %v3581_v6  ;;  %v3665_v5 = vld [vmem:[#allocation2 + $0x56c] ss:$16 sps:$4 sm:$0xff]   ;;  %v3660_v6 = vld [vmem:[#allocation2 + $0x560] ss:$16 sps:$4 sm:$0xff]  }
  0x9d   :  { %1712 = vmatpush1.bf16.msra.mxu0 %v3576_v7  ;;  %1876 = vmatpush1.bf16.msra.mxu1 %v3579_v8  ;;  %v3663_v7 = vld [vmem:[#allocation2 + $0x568] ss:$16 sps:$4 sm:$0xff]   ;;  %v3668_v8 = vld [vmem:[#allocation2 + $0x584] ss:$16 sps:$4 sm:$0xff]  }
  0x9e   :  { %1713 = vmatprep.subr.bf16.mxu0 %v3584_v10  ;;  %1877 = vmatprep.subr.bf16.mxu1 %v3587_v11  ;;  %v3671_v10 = vld [vmem:[#allocation2 + $0x58c] ss:$16 sps:$4 sm:$0xff]   ;;  %v3666_v11 = vld [vmem:[#allocation2 + $0x580] ss:$16 sps:$4 sm:$0xff]  }
  0xa1   :  { %1714 = vmatpush1.bf16.msra.mxu0 %v3582_v12  ;;  %1878 = vmatpush1.bf16.msra.mxu1 %v3585_v13  ;;  %v3669_v12 = vld [vmem:[#allocation2 + $0x588] ss:$16 sps:$4 sm:$0xff]   ;;  %v3674_v13 = vld [vmem:[#allocation2 + $0x5a4] ss:$16 sps:$4 sm:$0xff]  }
  0xa2   :  { %1715 = vmatprep.subr.bf16.mxu0 %v3590_v14  ;;  %1879 = vmatprep.subr.bf16.mxu1 %v3593_v15  ;;  %v3677_v14 = vld [vmem:[#allocation2 + $0x5ac] ss:$16 sps:$4 sm:$0xff]   ;;  %v3672_v15 = vld [vmem:[#allocation2 + $0x5a0] ss:$16 sps:$4 sm:$0xff]  }
  0xa5   :  { %1716 = vmatpush1.bf16.msra.mxu0 %v3588_v16  ;;  %1880 = vmatpush1.bf16.msra.mxu1 %v3591_v17  ;;  %v3675_v16 = vld [vmem:[#allocation2 + $0x5a8] ss:$16 sps:$4 sm:$0xff]   ;;  %v3680_v17 = vld [vmem:[#allocation2 + $0x5c4] ss:$16 sps:$4 sm:$0xff]  }
  0xa6   :  { %1726 = vmatprep.subr.bf16.mxu0 %v3596_v18  ;;  %1890 = vmatprep.subr.bf16.mxu1 %v3599_v19  ;;  %v3683_v18 = vld [vmem:[#allocation2 + $0x5cc] ss:$16 sps:$4 sm:$0xff]   ;;  %v75_v19 = vcombine.high %v4056_v23, %v4056_v23  ;;  %v3690_v23 = vld [vmem:[#allocation2 + $0x600] ss:$16 sps:$4 sm:$0xff]  }
  0xa8   :  { %1718 = vmatmul.mubr.bf16.vlgmr.msra.gmra.mrb[0].mxu0 %v102_v21  ;;  %1882 = vmatmul.mubr.bf16.vlgmr.msra.gmra.mrb[0].mxu1 %v102_v21  ;;  %v3681_v21 = vld [vmem:[#allocation2 + $0x5c8] ss:$16 sps:$4 sm:$0xff]  }
  0xa9   :  { %1727 = vmatpush1.bf16.msra.mxu0 %v3594_v20  ;;  %1891 = vmatpush1.bf16.msra.mxu1 %v3597_v22  ;;  %v3678_v20 = vld [vmem:[#allocation2 + $0x5c0] ss:$16 sps:$4 sm:$0xff]   ;;  %v3686_v22 = vld [vmem:[#allocation2 + $0x5e4] ss:$16 sps:$4 sm:$0xff]  }
  0xaa   :  { %1728 = vmatprep.subr.bf16.mxu0 %v3602_v24  ;;  %1892 = vmatprep.subr.bf16.mxu1 %v3605_v25  ;;  %v3689_v24 = vld [vmem:[#allocation2 + $0x5ec] ss:$16 sps:$4 sm:$0xff]   ;;  %v4067_v25 = vrot.slane %v75_v19, %v4040_v49  ;;  %v3696_v49 = vld [vmem:[#allocation2 + $0x620] ss:$16 sps:$4 sm:$0xff]   ;;  %v3770_v19 = vld [vmem:[#allocation2 + $0x7a4] ss:$16 sps:$4 sm:$0xff]  }
  0xab   :  { %1758 = vmatprep.mubr.bf16.mxu0 %v105_v31  ;;  %1922 = vmatprep.mubr.bf16.mxu1 %v105_v31 }
  0xac   :  { %v91_v31 = vcombine.high %v4067_v25, %v4067_v25 }
  0xad   :  { %1729 = vmatpush1.bf16.msra.mxu0 %v3600_v27  ;;  %1893 = vmatpush1.bf16.msra.mxu1 %v3603_v28  ;;  %v3687_v27 = vld [vmem:[#allocation2 + $0x5e8] ss:$16 sps:$4 sm:$0xff]   ;;  %v3692_v28 = vld [vmem:[#allocation2 + $0x604] ss:$16 sps:$4 sm:$0xff]  }
  0xae   :  { %1730 = vmatprep.subr.bf16.mxu0 %v3608_v29  ;;  %1894 = vmatprep.subr.bf16.mxu1 %v3611_v30  ;;  %v3695_v29 = vld [vmem:[#allocation2 + $0x60c] ss:$16 sps:$4 sm:$0xff]   ;;  %v3693_v30 = vld [vmem:[#allocation2 + $0x608] ss:$16 sps:$4 sm:$0xff]  }
  0xb1   :  { %1731 = vmatpush1.bf16.msra.mxu0 %v3606_v32  ;;  %1895 = vmatpush1.bf16.msra.mxu1 %v3609_v33  ;;  %v104_v32 = vpack.c.bf16 %v4060_v26, %v4060_v26  ;;  %v3698_v33 = vld [vmem:[#allocation2 + $0x624] ss:$16 sps:$4 sm:$0xff]  }
  0xb2   :  { %1732 = vmatprep.subr.bf16.mxu0 %v3614_v34  ;;  %1896 = vmatprep.subr.bf16.mxu1 %v3617_v35  ;;  %v3701_v34 = vld [vmem:[#allocation2 + $0x62c] ss:$16 sps:$4 sm:$0xff]   ;;  %v3699_v35 = vld [vmem:[#allocation2 + $0x628] ss:$16 sps:$4 sm:$0xff]   ;;  %v3710_v26 = vld [vmem:[#allocation2 + $0x664] ss:$16 sps:$4 sm:$0xff]  }
  0xb5   :  { %1733 = vmatpush1.bf16.msra.mxu0 %v3612_v36  ;;  %1897 = vmatpush1.bf16.msra.mxu1 %v3615_v37  ;;  %v107_v36 = vpack.c.bf16 %v91_v31, %v91_v31  ;;  %v3704_v37 = vld [vmem:[#allocation2 + $0x644] ss:$16 sps:$4 sm:$0xff]   ;;  %v3783_v31 = vld [vmem:[#allocation2 + $0x7e8] ss:$16 sps:$4 sm:$0xff]  }
  0xb6   :  { %1734 = vmatprep.subr.bf16.mxu0 %v3620_v38  ;;  %1898 = vmatprep.subr.bf16.mxu1 %v3623_v39  ;;  %v3707_v38 = vld [vmem:[#allocation2 + $0x64c] ss:$16 sps:$4 sm:$0xff]   ;;  %v3702_v39 = vld [vmem:[#allocation2 + $0x640] ss:$16 sps:$4 sm:$0xff]  }
  0xb9   :  { %1735 = vmatpush1.bf16.msra.mxu0 %v3618_v40  ;;  %1899 = vmatpush1.bf16.msra.mxu1 %v3621_v41  ;;  %v3705_v40 = vld [vmem:[#allocation2 + $0x648] ss:$16 sps:$4 sm:$0xff]   ;;  %v3713_v41 = vld [vmem:[#allocation2 + $0x66c] ss:$16 sps:$4 sm:$0xff]  }
  0xba   :  { %1736 = vmatprep.subr.bf16.mxu0 %v3626_v42  ;;  %1900 = vmatprep.subr.bf16.mxu1 %v3629_v44  ;;  %v3708_v42 = vld [vmem:[#allocation2 + $0x660] ss:$16 sps:$4 sm:$0xff]   ;;  %v3711_v44 = vld [vmem:[#allocation2 + $0x668] ss:$16 sps:$4 sm:$0xff]  }
  0xbd   :  { %1737 = vmatpush1.bf16.msra.mxu0 %v3624_v45  ;;  %1901 = vmatpush1.bf16.msra.mxu1 %v3627_v46  ;;  %v3716_v45 = vld [vmem:[#allocation2 + $0x684] ss:$16 sps:$4 sm:$0xff]   ;;  %v3719_v46 = vld [vmem:[#allocation2 + $0x68c] ss:$16 sps:$4 sm:$0xff]  }
  0xbe   :  { %1738 = vmatprep.subr.bf16.mxu0 %v3632_v47  ;;  %1902 = vmatprep.subr.bf16.mxu1 %v3635_v48  ;;  %v3714_v47 = vld [vmem:[#allocation2 + $0x680] ss:$16 sps:$4 sm:$0xff]   ;;  %v3717_v48 = vld [vmem:[#allocation2 + $0x688] ss:$16 sps:$4 sm:$0xff]  }
  0xc1   :  { %1739 = vmatpush1.bf16.msra.mxu0 %v3630_v50  ;;  %1903 = vmatpush1.bf16.msra.mxu1 %v3633_v51  ;;  %v3722_v50 = vld [vmem:[#allocation2 + $0x6a4] ss:$16 sps:$4 sm:$0xff]   ;;  %v3725_v51 = vld [vmem:[#allocation2 + $0x6ac] ss:$16 sps:$4 sm:$0xff]  }
  0xc2   :  { %1740 = vmatprep.subr.bf16.mxu0 %v3638_v52  ;;  %1904 = vmatprep.subr.bf16.mxu1 %v3641_v53  ;;  %v3720_v52 = vld [vmem:[#allocation2 + $0x6a0] ss:$16 sps:$4 sm:$0xff]   ;;  %v3723_v53 = vld [vmem:[#allocation2 + $0x6a8] ss:$16 sps:$4 sm:$0xff]  }
  0xc5   :  { %1741 = vmatpush1.bf16.msra.mxu0 %v3636_v54  ;;  %1905 = vmatpush1.bf16.msra.mxu1 %v3639_v55  ;;  %v3728_v54 = vld [vmem:[#allocation2 + $0x6c4] ss:$16 sps:$4 sm:$0xff]   ;;  %v3731_v55 = vld [vmem:[#allocation2 + $0x6cc] ss:$16 sps:$4 sm:$0xff]  }
  0xc6   :  { %1742 = vmatprep.subr.bf16.mxu0 %v3644_v56  ;;  %1906 = vmatprep.subr.bf16.mxu1 %v3647_v57  ;;  %v3726_v56 = vld [vmem:[#allocation2 + $0x6c0] ss:$16 sps:$4 sm:$0xff]   ;;  %v3729_v57 = vld [vmem:[#allocation2 + $0x6c8] ss:$16 sps:$4 sm:$0xff]  }
  0xc9   :  { %1743 = vmatpush1.bf16.msra.mxu0 %v3642_v58  ;;  %1907 = vmatpush1.bf16.msra.mxu1 %v3645_v59  ;;  %v3734_v58 = vld [vmem:[#allocation2 + $0x6e4] ss:$16 sps:$4 sm:$0xff]   ;;  %v3737_v59 = vld [vmem:[#allocation2 + $0x6ec] ss:$16 sps:$4 sm:$0xff]  }
  0xca   :  { %1744 = vmatprep.subr.bf16.mxu0 %v3650_v60  ;;  %1908 = vmatprep.subr.bf16.mxu1 %v3653_v61  ;;  %v3732_v60 = vld [vmem:[#allocation2 + $0x6e0] ss:$16 sps:$4 sm:$0xff]   ;;  %v3735_v61 = vld [vmem:[#allocation2 + $0x6e8] ss:$16 sps:$4 sm:$0xff]  }
  0xcd   :  { %1745 = vmatpush1.bf16.msra.mxu0 %v3648_v62  ;;  %1909 = vmatpush1.bf16.msra.mxu1 %v3651_v63  ;;  %v3740_v62 = vld [vmem:[#allocation2 + $0x704] ss:$16 sps:$4 sm:$0xff]   ;;  %v3743_v63 = vld [vmem:[#allocation2 + $0x70c] ss:$16 sps:$4 sm:$0xff]  }
  0xce   :  { %1746 = vmatprep.subr.bf16.mxu0 %v3656_v0  ;;  %1910 = vmatprep.subr.bf16.mxu1 %v3659_v1  ;;  %v3738_v0 = vld [vmem:[#allocation2 + $0x700] ss:$16 sps:$4 sm:$0xff]   ;;  %v3741_v1 = vld [vmem:[#allocation2 + $0x708] ss:$16 sps:$4 sm:$0xff]  }
  0xd1   :  { %1747 = vmatpush1.bf16.msra.mxu0 %v3654_v2  ;;  %1911 = vmatpush1.bf16.msra.mxu1 %v3657_v3  ;;  %v3746_v2 = vld [vmem:[#allocation2 + $0x724] ss:$16 sps:$4 sm:$0xff]   ;;  %v3749_v3 = vld [vmem:[#allocation2 + $0x72c] ss:$16 sps:$4 sm:$0xff]  }
  0xd2   :  { %1748 = vmatprep.subr.bf16.mxu0 %v3662_v4  ;;  %1912 = vmatprep.subr.bf16.mxu1 %v3665_v5  ;;  %v3744_v4 = vld [vmem:[#allocation2 + $0x720] ss:$16 sps:$4 sm:$0xff]   ;;  %v3747_v5 = vld [vmem:[#allocation2 + $0x728] ss:$16 sps:$4 sm:$0xff]  }
  0xd5   :  { %1749 = vmatpush1.bf16.msra.mxu0 %v3660_v6  ;;  %1913 = vmatpush1.bf16.msra.mxu1 %v3663_v7  ;;  %v3752_v6 = vld [vmem:[#allocation2 + $0x744] ss:$16 sps:$4 sm:$0xff]   ;;  %v3755_v7 = vld [vmem:[#allocation2 + $0x74c] ss:$16 sps:$4 sm:$0xff]  }
  0xd6   :  { %1750 = vmatprep.subr.bf16.mxu0 %v3668_v8  ;;  %1914 = vmatprep.subr.bf16.mxu1 %v3671_v10  ;;  %v3750_v8 = vld [vmem:[#allocation2 + $0x740] ss:$16 sps:$4 sm:$0xff]   ;;  %v3753_v10 = vld [vmem:[#allocation2 + $0x748] ss:$16 sps:$4 sm:$0xff]  }
  0xd9   :  { %1751 = vmatpush1.bf16.msra.mxu0 %v3666_v11  ;;  %1915 = vmatpush1.bf16.msra.mxu1 %v3669_v12  ;;  %v3758_v11 = vld [vmem:[#allocation2 + $0x764] ss:$16 sps:$4 sm:$0xff]   ;;  %v3761_v12 = vld [vmem:[#allocation2 + $0x76c] ss:$16 sps:$4 sm:$0xff]  }
  0xda   :  { %1752 = vmatprep.subr.bf16.mxu0 %v3674_v13  ;;  %1916 = vmatprep.subr.bf16.mxu1 %v3677_v14  ;;  %v3756_v13 = vld [vmem:[#allocation2 + $0x760] ss:$16 sps:$4 sm:$0xff]   ;;  %v3759_v14 = vld [vmem:[#allocation2 + $0x768] ss:$16 sps:$4 sm:$0xff]  }
  0xdd   :  { %1753 = vmatpush1.bf16.msra.mxu0 %v3672_v15  ;;  %1917 = vmatpush1.bf16.msra.mxu1 %v3675_v16  ;;  %v3764_v15 = vld [vmem:[#allocation2 + $0x784] ss:$16 sps:$4 sm:$0xff]   ;;  %v3767_v16 = vld [vmem:[#allocation2 + $0x78c] ss:$16 sps:$4 sm:$0xff]  }
  0xde   :  { %1754 = vmatprep.subr.bf16.mxu0 %v3680_v17  ;;  %1918 = vmatprep.subr.bf16.mxu1 %v3683_v18  ;;  %v3762_v17 = vld [vmem:[#allocation2 + $0x780] ss:$16 sps:$4 sm:$0xff]   ;;  %v3765_v18 = vld [vmem:[#allocation2 + $0x788] ss:$16 sps:$4 sm:$0xff]  }
  0xe1   :  { %1755 = vmatpush1.bf16.msra.mxu0 %v3678_v20  ;;  %1919 = vmatpush1.bf16.msra.mxu1 %v3681_v21  ;;  %v3773_v20 = vld [vmem:[#allocation2 + $0x7ac] ss:$16 sps:$4 sm:$0xff]   ;;  %v3768_v21 = vld [vmem:[#allocation2 + $0x7a0] ss:$16 sps:$4 sm:$0xff]  }
  0xe2   :  { %1756 = vmatprep.subr.bf16.mxu0 %v3686_v22  ;;  %1920 = vmatprep.subr.bf16.mxu1 %v3689_v24  ;;  %v3771_v22 = vld [vmem:[#allocation2 + $0x7a8] ss:$16 sps:$4 sm:$0xff]   ;;  %v3776_v24 = vld [vmem:[#allocation2 + $0x7c4] ss:$16 sps:$4 sm:$0xff]  }
  0xe5   :  { %1757 = vmatpush1.bf16.msra.mxu0 %v3684_v9  ;;  %1921 = vmatpush1.bf16.msra.mxu1 %v3687_v27  ;;  %v3779_v9 = vld [vmem:[#allocation2 + $0x7cc] ss:$16 sps:$4 sm:$0xff]   ;;  %v3774_v27 = vld [vmem:[#allocation2 + $0x7c0] ss:$16 sps:$4 sm:$0xff]  }
  0xe6   :  { %1767 = vmatprep.subr.bf16.mxu0 %v3692_v28  ;;  %1931 = vmatprep.subr.bf16.mxu1 %v3695_v29  ;;  %v3777_v28 = vld [vmem:[#allocation2 + $0x7c8] ss:$16 sps:$4 sm:$0xff]   ;;  %v3782_v29 = vld [vmem:[#allocation2 + $0x7e4] ss:$16 sps:$4 sm:$0xff]  }
  0xe8   :  { %1759 = vmatmul.mubr.bf16.vlgmr.msra.gmra.mrb[0].mxu0 %v104_v32  ;;  %1923 = vmatmul.mubr.bf16.vlgmr.msra.gmra.mrb[0].mxu1 %v104_v32  ;;  %v3789_v32 = vld [vmem:[#allocation5 + $0x4] ss:$8 sps:$4 sm:$0xff]  }
  0xe9   :  { %1768 = vmatpush1.bf16.msra.mxu0 %v3690_v23  ;;  %1932 = vmatpush1.bf16.msra.mxu1 %v3693_v30  ;;  %v3785_v23 = vld [vmem:[#allocation2 + $0x7ec] ss:$16 sps:$4 sm:$0xff]   ;;  %v3780_v30 = vld [vmem:[#allocation2 + $0x7e0] ss:$16 sps:$4 sm:$0xff]  }
  0xea   :  { %1769 = vmatprep.subr.bf16.mxu0 %v3698_v33  ;;  %1933 = vmatprep.subr.bf16.mxu1 %v3701_v34  ;;  %v106_v33 = vpack.c.bf16 %v4067_v25, %v4067_v25  ;;  %v3787_v34 = vld [vmem:[#allocation5] ss:$8 sps:$4 sm:$0xff]  }
  0xeb   :  { %1799 = vmatprep.mubr.bf16.mxu0 %v107_v36  ;;  %1963 = vmatprep.mubr.bf16.mxu1 %v107_v36  ;;  %v3795_v36 = vld [vmem:[#allocation5 + $0x24] ss:$8 sps:$4 sm:$0xff]   ;;  %v3799_v25 = vld [vmem:[#allocation5 + $0x40] ss:$8 sps:$4 sm:$0xff]  }
  0xed   :  { %1770 = vmatpush1.bf16.msra.mxu0 %v3696_v49  ;;  %1934 = vmatpush1.bf16.msra.mxu1 %v3699_v35  ;;  %v3792_v49 = vld [vmem:[#allocation5 + $0x14] ss:$8 sps:$4 sm:$0xff]   ;;  %v3790_v35 = vld [vmem:[#allocation5 + $0x10] ss:$8 sps:$4 sm:$0xff]  }
  0xee   :  { %1771 = vmatprep.subr.bf16.mxu0 %v3704_v37  ;;  %1935 = vmatprep.subr.bf16.mxu1 %v3707_v38  ;;  %v3793_v37 = vld [vmem:[#allocation5 + $0x20] ss:$8 sps:$4 sm:$0xff]   ;;  %v3798_v38 = vld [vmem:[#allocation5 + $0x34] ss:$8 sps:$4 sm:$0xff]  }
  0xf1   :  { %1772 = vmatpush1.bf16.msra.mxu0 %v3702_v39  ;;  %1936 = vmatpush1.bf16.msra.mxu1 %v3705_v40  ;;  %v3796_v39 = vld [vmem:[#allocation5 + $0x30] ss:$8 sps:$4 sm:$0xff]   ;;  %v3801_v40 = vld [vmem:[#allocation5 + $0x44] ss:$8 sps:$4 sm:$0xff]  }
  0xf2   :  { %1773 = vmatprep.subr.bf16.mxu0 %v3710_v26  ;;  %1937 = vmatprep.subr.bf16.mxu1 %v3713_v41  ;;  %v3804_v26 = vld [vmem:[#allocation5 + $0x54] ss:$8 sps:$4 sm:$0xff]   ;;  %v3802_v41 = vld [vmem:[#allocation5 + $0x50] ss:$8 sps:$4 sm:$0xff]  }
  0xf5   :  { %1774 = vmatpush1.bf16.msra.mxu0 %v3708_v42  ;;  %1938 = vmatpush1.bf16.msra.mxu1 %v3711_v44  ;;  %v3807_v42 = vld [vmem:[#allocation5 + $0x64] ss:$8 sps:$4 sm:$0xff]   ;;  %v3805_v44 = vld [vmem:[#allocation5 + $0x60] ss:$8 sps:$4 sm:$0xff]  }
  0xf6   :  { %1775 = vmatprep.subr.bf16.mxu0 %v3716_v45  ;;  %1939 = vmatprep.subr.bf16.mxu1 %v3719_v46  ;;  %v3810_v45 = vld [vmem:[#allocation5 + $0x74] ss:$8 sps:$4 sm:$0xff]   ;;  %v3808_v46 = vld [vmem:[#allocation5 + $0x70] ss:$8 sps:$4 sm:$0xff]  }
  0xf9   :  { %1776 = vmatpush1.bf16.msra.mxu0 %v3714_v47  ;;  %1940 = vmatpush1.bf16.msra.mxu1 %v3717_v48  ;;  %v3813_v47 = vld [vmem:[#allocation5 + $0x84] ss:$8 sps:$4 sm:$0xff]   ;;  %v3811_v48 = vld [vmem:[#allocation5 + $0x80] ss:$8 sps:$4 sm:$0xff]  }
  0xfa   :  { %1777 = vmatprep.subr.bf16.mxu0 %v3722_v50  ;;  %1941 = vmatprep.subr.bf16.mxu1 %v3725_v51  ;;  %v3816_v50 = vld [vmem:[#allocation5 + $0x94] ss:$8 sps:$4 sm:$0xff]   ;;  %v3814_v51 = vld [vmem:[#allocation5 + $0x90] ss:$8 sps:$4 sm:$0xff]  }
  0xfd   :  { %1778 = vmatpush1.bf16.msra.mxu0 %v3720_v52  ;;  %1942 = vmatpush1.bf16.msra.mxu1 %v3723_v53  ;;  %v3819_v52 = vld [vmem:[#allocation5 + $0xa4] ss:$8 sps:$4 sm:$0xff]   ;;  %v3817_v53 = vld [vmem:[#allocation5 + $0xa0] ss:$8 sps:$4 sm:$0xff]  }
  0xfe   :  { %1779 = vmatprep.subr.bf16.mxu0 %v3728_v54  ;;  %1943 = vmatprep.subr.bf16.mxu1 %v3731_v55  ;;  %v3822_v54 = vld [vmem:[#allocation5 + $0xb4] ss:$8 sps:$4 sm:$0xff]   ;;  %v3820_v55 = vld [vmem:[#allocation5 + $0xb0] ss:$8 sps:$4 sm:$0xff]  }
 0x101   :  { %1780 = vmatpush1.bf16.msra.mxu0 %v3726_v56  ;;  %1944 = vmatpush1.bf16.msra.mxu1 %v3729_v57  ;;  %v3825_v56 = vld [vmem:[#allocation5 + $0xc4] ss:$8 sps:$4 sm:$0xff]   ;;  %v3823_v57 = vld [vmem:[#allocation5 + $0xc0] ss:$8 sps:$4 sm:$0xff]  }
 0x102   :  { %1781 = vmatprep.subr.bf16.mxu0 %v3734_v58  ;;  %1945 = vmatprep.subr.bf16.mxu1 %v3737_v59  ;;  %v3828_v58 = vld [vmem:[#allocation5 + $0xd4] ss:$8 sps:$4 sm:$0xff]   ;;  %v3826_v59 = vld [vmem:[#allocation5 + $0xd0] ss:$8 sps:$4 sm:$0xff]  }
 0x105   :  { %1782 = vmatpush1.bf16.msra.mxu0 %v3732_v60  ;;  %1946 = vmatpush1.bf16.msra.mxu1 %v3735_v61  ;;  %v3831_v60 = vld [vmem:[#allocation5 + $0xe4] ss:$8 sps:$4 sm:$0xff]   ;;  %v3829_v61 = vld [vmem:[#allocation5 + $0xe0] ss:$8 sps:$4 sm:$0xff]  }
 0x106   :  { %1783 = vmatprep.subr.bf16.mxu0 %v3740_v62  ;;  %1947 = vmatprep.subr.bf16.mxu1 %v3743_v63  ;;  %v3834_v62 = vld [vmem:[#allocation5 + $0xf4] ss:$8 sps:$4 sm:$0xff]   ;;  %v3832_v63 = vld [vmem:[#allocation5 + $0xf0] ss:$8 sps:$4 sm:$0xff]  }
 0x109   :  { %1784 = vmatpush1.bf16.msra.mxu0 %v3738_v0  ;;  %1948 = vmatpush1.bf16.msra.mxu1 %v3741_v1  ;;  %v3837_v0 = vld [vmem:[#allocation5 + $0x104] ss:$8 sps:$4 sm:$0xff]  }
 0x10a   :  { %1785 = vmatprep.subr.bf16.mxu0 %v3746_v2  ;;  %1949 = vmatprep.subr.bf16.mxu1 %v3749_v3  ;;  %v2504_v1 = vld [vmem:[%s4324_s4 + $0x80] sm:$0xff]  ;;  %v2505_v2 = vld [vmem:[%s4324_s4 + $0x88] sm:$0xff] }
 0x10b   :  { %v2488_v3 = vld [vmem:[%s4324_s4] sm:$0xff] }
 0x10d   :  { %1786 = vmatpush1.bf16.msra.mxu0 %v3744_v4  ;;  %1950 = vmatpush1.bf16.msra.mxu1 %v3747_v5  ;;  %v3295_v4 = vpack.c.bf16 %v2505_v2, %v2504_v1  ;;  %v2489_v5 = vld [vmem:[%s4324_s4 + $0x8] sm:$0xff]  ;;  %v3876_v1 = vld [vmem:[#allocation5 + $0x1d4] ss:$8 sps:$4 sm:$0xff]   ;;  %v3874_v2 = vld [vmem:[#allocation5 + $0x1d0] ss:$8 sps:$4 sm:$0xff]  }
 0x10e   :  { %1787 = vmatprep.subr.bf16.mxu0 %v3752_v6  ;;  %1951 = vmatprep.subr.bf16.mxu1 %v3755_v7  ;;  %v2506_v6 = vld [vmem:[%s4324_s4 + $0x90] sm:$0xff]  ;;  %v2507_v7 = vld [vmem:[%s4324_s4 + $0x98] sm:$0xff] }
 0x111   :  { %1788 = vmatpush1.bf16.msra.mxu0 %v3750_v8  ;;  %1952 = vmatpush1.bf16.msra.mxu1 %v3753_v10  ;;  %v3297_v8 = vpack.c.bf16 %v2489_v5, %v2488_v3  ;;  %v3299_v10 = vpack.c.bf16 %v2507_v7, %v2506_v6  ;;  %v3879_v3 = vld [vmem:[#allocation5 + $0x1e4] ss:$8 sps:$4 sm:$0xff]   ;;  %v3882_v5 = vld [vmem:[#allocation5 + $0x1f4] ss:$8 sps:$4 sm:$0xff]   ;;  %v3880_v7 = vld [vmem:[#allocation5 + $0x1f0] ss:$8 sps:$4 sm:$0xff]  }
 0x112   :  { %1789 = vmatprep.subr.bf16.mxu0 %v3758_v11  ;;  %1953 = vmatprep.subr.bf16.mxu1 %v3761_v12  ;;  %v2490_v11 = vld [vmem:[%s4324_s4 + $0x10] sm:$0xff]  ;;  %v2491_v12 = vld [vmem:[%s4324_s4 + $0x18] sm:$0xff] }
 0x115   :  { %1790 = vmatpush1.bf16.msra.mxu0 %v3756_v13  ;;  %1954 = vmatpush1.bf16.msra.mxu1 %v3759_v14  ;;  %v2508_v13 = vld [vmem:[%s4324_s4 + $0xa0] sm:$0xff]  ;;  %v2509_v14 = vld [vmem:[%s4324_s4 + $0xa8] sm:$0xff] }
 0x116   :  { %1791 = vmatprep.subr.bf16.mxu0 %v3764_v15  ;;  %1955 = vmatprep.subr.bf16.mxu1 %v3767_v16  ;;  %v3301_v15 = vpack.c.bf16 %v2491_v12, %v2490_v11  ;;  %v3303_v16 = vpack.c.bf16 %v2509_v14, %v2508_v13  ;;  %v2494_v11 = vld [vmem:[%s4324_s4 + $0x30] sm:$0xff]  ;;  %v2495_v12 = vld [vmem:[%s4324_s4 + $0x38] sm:$0xff]  ;;  %v2512_v14 = vld [vmem:[%s4324_s4 + $0xc0] sm:$0xff] }
 0x117   :  { %v3309_v13 = vpack.c.bf16 %v2495_v12, %v2494_v11  ;;  %v2592_v11 = vld [vmem:[%s4325_s5 + $0x8] sm:$0xff]  ;;  %v2594_v12 = vld [vmem:[%s4325_s5 + $0x18] sm:$0xff] }
 0x119   :  { %1792 = vmatpush1.bf16.msra.mxu0 %v3762_v17  ;;  %1956 = vmatpush1.bf16.msra.mxu1 %v3765_v18  ;;  %v2492_v17 = vld [vmem:[%s4324_s4 + $0x20] sm:$0xff]  ;;  %v2493_v18 = vld [vmem:[%s4324_s4 + $0x28] sm:$0xff] }
 0x11a   :  { %1793 = vmatprep.subr.bf16.mxu0 %v3770_v19  ;;  %1957 = vmatprep.subr.bf16.mxu1 %v3773_v20  ;;  %v2510_v19 = vld [vmem:[%s4324_s4 + $0xb0] sm:$0xff]  ;;  %v2511_v20 = vld [vmem:[%s4324_s4 + $0xb8] sm:$0xff] }
 0x11d   :  { %1794 = vmatpush1.bf16.msra.mxu0 %v3768_v21  ;;  %1958 = vmatpush1.bf16.msra.mxu1 %v3771_v22  ;;  %v3305_v21 = vpack.c.bf16 %v2493_v18, %v2492_v17  ;;  %v3307_v22 = vpack.c.bf16 %v2511_v20, %v2510_v19  ;;  %v2496_v17 = vld [vmem:[%s4324_s4 + $0x40] sm:$0xff]  ;;  %v2497_v18 = vld [vmem:[%s4324_s4 + $0x48] sm:$0xff]  ;;  %v2514_v20 = vld [vmem:[%s4324_s4 + $0xd0] sm:$0xff] }
 0x11e   :  { %1795 = vmatprep.subr.bf16.mxu0 %v3776_v24  ;;  %1959 = vmatprep.subr.bf16.mxu1 %v3779_v9  ;;  %v3313_v19 = vpack.c.bf16 %v2497_v18, %v2496_v17  ;;  %v3970_v17 = vmov 0.0  }
 0x121   :  { %1796 = vmatpush1.bf16.msra.mxu0 %v3774_v27  ;;  %1960 = vmatpush1.bf16.msra.mxu1 %v3777_v28 }
 0x122   :  { %1797 = vmatprep.subr.bf16.mxu0 %v3782_v29  ;;  %1961 = vmatprep.subr.bf16.mxu1 %v3785_v23 }
 0x125   :  { %1798 = vmatpush1.bf16.msra.mxu0 %v3780_v30  ;;  %1962 = vmatpush1.bf16.msra.mxu1 %v3783_v31 }
 0x126   :  { %2372 = vmatprep.subr.bf16.mxu0 %v3789_v32  ;;  %3296 = vmatprep.subr.bf16.mxu1 %v3295_v4  ;;  %v3877_v4 = vld [vmem:[#allocation5 + $0x1e0] ss:$8 sps:$4 sm:$0xff]  }
 0x128   :  { %1800 = vmatmul.mubr.bf16.vlgmr.msra.gmra.mrb[0].mxu0 %v106_v33  ;;  %1964 = vmatmul.mubr.bf16.vlgmr.msra.gmra.mrb[0].mxu1 %v106_v33 }
 0x129   :  { %2373 = vmatpush1.bf16.msra.mxu0 %v3787_v34  ;;  %3298 = vmatpush3.bf16.msra.mxu1 %v3297_v8 }
 0x12a   :  { %2374 = vmatprep.subr.bf16.mxu0 %v3792_v49  ;;  %3300 = vmatprep.subr.bf16.mxu1 %v3299_v10 }
 0x12d   :  { %2375 = vmatpush1.bf16.msra.mxu0 %v3790_v35  ;;  %3302 = vmatpush3.bf16.msra.mxu1 %v3301_v15  ;;  %v2513_v15 = vld [vmem:[%s4324_s4 + $0xc8] sm:$0xff] }
 0x12e   :  { %2376 = vmatprep.subr.bf16.mxu0 %v3795_v36  ;;  %3304 = vmatprep.subr.bf16.mxu1 %v3303_v16  ;;  %v3311_v16 = vpack.c.bf16 %v2513_v15, %v2512_v14  ;;  %v2591_v14 = vld [vmem:[%s4325_s5] sm:$0xff]  ;;  %v2593_v15 = vld [vmem:[%s4325_s5 + $0x10] sm:$0xff] }
 0x131   :  { %2377 = vmatpush1.bf16.msra.mxu0 %v3793_v37  ;;  %3306 = vmatpush3.bf16.msra.mxu1 %v3305_v21  ;;  %v2515_v21 = vld [vmem:[%s4324_s4 + $0xd8] sm:$0xff] }
 0x132   :  { %2378 = vmatprep.subr.bf16.mxu0 %v3798_v38  ;;  %3308 = vmatprep.subr.bf16.mxu1 %v3307_v22  ;;  %v3835_v38 = vld [vmem:[#allocation5 + $0x100] ss:$8 sps:$4 sm:$0xff]   ;;  %v3315_v22 = vpack.c.bf16 %v2515_v21, %v2514_v20 }
 0x135   :  { %2379 = vmatpush1.bf16.msra.mxu0 %v3796_v39  ;;  %3310 = vmatpush3.bf16.msra.mxu1 %v3309_v13  ;;  %v3327_v13 = vpack.c.bf16 %v2594_v12, %v2592_v11 }
 0x136   :  { %2380 = vmatprep.subr.bf16.mxu0 %v3801_v40  ;;  %v3840_v40 = vld [vmem:[#allocation5 + $0x114] ss:$8 sps:$4 sm:$0xff]   ;;  %3312 = vmatprep.subr.bf16.mxu1 %v3311_v16  ;;  %v3329_v16 = vpack.c.bf16 %v2593_v15, %v2591_v14 }
 0x139   :  { %2381 = vmatpush1.bf16.msra.mxu0 %v3799_v25  ;;  %3314 = vmatpush3.bf16.msra.mxu1 %v3313_v19 }
 0x13a   :  { %2382 = vmatprep.subr.bf16.mxu0 %v3804_v26  ;;  %v3838_v26 = vld [vmem:[#allocation5 + $0x110] ss:$8 sps:$4 sm:$0xff]   ;;  %3316 = vmatprep.subr.bf16.mxu1 %v3315_v22  ;;  %v2789_v22 = vld [vmem:[%s4323_s3 + $0x80] sm:$0xff] }
 0x13d   :  { %2383 = vmatpush1.bf16.msra.mxu0 %v3802_v41  ;;  %v3843_v41 = vld [vmem:[#allocation5 + $0x124] ss:$8 sps:$4 sm:$0xff]  }
 0x13e   :  { %2384 = vmatprep.subr.bf16.mxu0 %v3807_v42  ;;  %v3841_v42 = vld [vmem:[#allocation5 + $0x120] ss:$8 sps:$4 sm:$0xff]  }
 0x141   :  { %2385 = vmatpush1.bf16.msra.mxu0 %v3805_v44  ;;  %v3846_v44 = vld [vmem:[#allocation5 + $0x134] ss:$8 sps:$4 sm:$0xff]  }
 0x142   :  { %2386 = vmatprep.subr.bf16.mxu0 %v3810_v45  ;;  %v3844_v45 = vld [vmem:[#allocation5 + $0x130] ss:$8 sps:$4 sm:$0xff]  }
 0x145   :  { %2387 = vmatpush1.bf16.msra.mxu0 %v3808_v46  ;;  %v3849_v46 = vld [vmem:[#allocation5 + $0x144] ss:$8 sps:$4 sm:$0xff]  }
 0x146   :  { %2388 = vmatprep.subr.bf16.mxu0 %v3813_v47  ;;  %v3847_v47 = vld [vmem:[#allocation5 + $0x140] ss:$8 sps:$4 sm:$0xff]  }
 0x149   :  { %2389 = vmatpush1.bf16.msra.mxu0 %v3811_v48  ;;  %v3852_v48 = vld [vmem:[#allocation5 + $0x154] ss:$8 sps:$4 sm:$0xff]  }
 0x14a   :  { %2390 = vmatprep.subr.bf16.mxu0 %v3816_v50  ;;  %v3850_v50 = vld [vmem:[#allocation5 + $0x150] ss:$8 sps:$4 sm:$0xff]  }
 0x14d   :  { %2391 = vmatpush1.bf16.msra.mxu0 %v3814_v51  ;;  %v3855_v51 = vld [vmem:[#allocation5 + $0x164] ss:$8 sps:$4 sm:$0xff]  }
 0x14e   :  { %2392 = vmatprep.subr.bf16.mxu0 %v3819_v52  ;;  %v3853_v52 = vld [vmem:[#allocation5 + $0x160] ss:$8 sps:$4 sm:$0xff]  }
 0x151   :  { %2393 = vmatpush1.bf16.msra.mxu0 %v3817_v53  ;;  %v3858_v53 = vld [vmem:[#allocation5 + $0x174] ss:$8 sps:$4 sm:$0xff]  }
 0x152   :  { %2394 = vmatprep.subr.bf16.mxu0 %v3822_v54  ;;  %v3856_v54 = vld [vmem:[#allocation5 + $0x170] ss:$8 sps:$4 sm:$0xff]  }
 0x155   :  { %2395 = vmatpush1.bf16.msra.mxu0 %v3820_v55  ;;  %v3861_v55 = vld [vmem:[#allocation5 + $0x184] ss:$8 sps:$4 sm:$0xff]  }
 0x156   :  { %2396 = vmatprep.subr.bf16.mxu0 %v3825_v56  ;;  %v3859_v56 = vld [vmem:[#allocation5 + $0x180] ss:$8 sps:$4 sm:$0xff]  }
 0x159   :  { %2397 = vmatpush1.bf16.msra.mxu0 %v3823_v57  ;;  %v3864_v57 = vld [vmem:[#allocation5 + $0x194] ss:$8 sps:$4 sm:$0xff]  }
 0x15a   :  { %2398 = vmatprep.subr.bf16.mxu0 %v3828_v58  ;;  %v3862_v58 = vld [vmem:[#allocation5 + $0x190] ss:$8 sps:$4 sm:$0xff]  }
 0x15d   :  { %2399 = vmatpush1.bf16.msra.mxu0 %v3826_v59  ;;  %v3867_v59 = vld [vmem:[#allocation5 + $0x1a4] ss:$8 sps:$4 sm:$0xff]  }
 0x15e   :  { %2400 = vmatprep.subr.bf16.mxu0 %v3831_v60  ;;  %v3865_v60 = vld [vmem:[#allocation5 + $0x1a0] ss:$8 sps:$4 sm:$0xff]  }
 0x161   :  { %2401 = vmatpush1.bf16.msra.mxu0 %v3829_v61  ;;  %v3870_v61 = vld [vmem:[#allocation5 + $0x1b4] ss:$8 sps:$4 sm:$0xff]  }
 0x162   :  { %2402 = vmatprep.subr.bf16.mxu0 %v3834_v62  ;;  %v3868_v62 = vld [vmem:[#allocation5 + $0x1b0] ss:$8 sps:$4 sm:$0xff]  }
 0x165   :  { %2403 = vmatpush1.bf16.msra.mxu0 %v3832_v63  ;;  %v3873_v63 = vld [vmem:[#allocation5 + $0x1c4] ss:$8 sps:$4 sm:$0xff]  }
 0x166   :  { %2413 = vmatprep.subr.bf16.mxu0 %v3837_v0  ;;  %v3871_v0 = vld [vmem:[#allocation5 + $0x1c0] ss:$8 sps:$4 sm:$0xff]  }
 0x1fb   :  { %v1801_v24 = vpop.f32.mrb[0].mxu0  ;;  %v4117_v9 = vpop.f32.mrb[0].mxu1 }
 0x1fc   :  { %vm1972_vm0 = vcmp.ge.f32.partialorder %v1801_v24, 0.0  ;;  %v1976_v27 = vmul.f32 0.2, %v1801_v24  ;;  %v1803_v28 = vpop.f32.mrb[1].mxu0  ;;  %v1967_v29 = vpop.f32.mrb[1].mxu1  ;;  %vm1974_vm3 = vcmp.ge.f32.partialorder %v4117_v9, 0.0 }
 0x1fd   :  { %vm1973_vm1 = vcmp.ge.f32.partialorder %v1803_v28, 0.0  ;;  %v1977_v23 = vmul.f32 0.2, %v1803_v28  ;;  %v1805_v30 = vpop.f32.mrb[2].mxu0  ;;  %v1969_v31 = vpop.f32.mrb[2].mxu1  ;;  %vm1975_vm2 = vcmp.ge.f32.partialorder %v1967_v29, 0.0 }
 0x1fe   :  { %v1980_v32 = vsel %vm1972_vm0, %v1801_v24, %v1976_v27  ;;  %v1979_v33 = vmul.f32 0.2, %v1967_v29  ;;  %v1806_v34 = vpop.f32.mrb[3].mxu0  ;;  %v1970_v49 = vpop.f32.mrb[3].mxu1  ;;  %v1978_v6 = vmul.f32 0.2, %v4117_v9 }
 0x1ff   :  { %v1981_v35 = vsel %vm1973_vm1, %v1803_v28, %v1977_v23  ;;  %v1984_v39 = vpack.c.bf16 %v1980_v32, %v1980_v32  ;;  %v2498_v24 = vld [vmem:[%s4324_s4 + $0x50] sm:$0xff]  ;;  %v2516_v28 = vld [vmem:[%s4324_s4 + $0xe0] sm:$0xff]  ;;  %v2501_v31 = vld [vmem:[%s4324_s4 + $0x68] sm:$0xff] }
 0x200   :  { %v1985_v36 = vpack.c.bf16 %v1981_v35, %v1981_v35  ;;  %v1983_v37 = vsel %vm1975_vm2, %v1967_v29, %v1979_v33  ;;  %v1982_v8 = vsel %vm1974_vm3, %v4117_v9, %v1978_v6  ;;  %v2499_v9 = vld [vmem:[%s4324_s4 + $0x58] sm:$0xff]  ;;  %v2517_v29 = vld [vmem:[%s4324_s4 + $0xe8] sm:$0xff]  ;;  %v2500_v30 = vld [vmem:[%s4324_s4 + $0x60] sm:$0xff] }
 0x201   :  { %v1987_v25 = vpack.c.bf16 %v1983_v37, %v1983_v37  ;;  %v1986_v10 = vpack.c.bf16 %v1982_v8, %v1982_v8  ;;  %v3317_v27 = vpack.c.bf16 %v2499_v9, %v2498_v24  ;;  %v3319_v23 = vpack.c.bf16 %v2517_v29, %v2516_v28  ;;  %v2518_v33 = vld [vmem:[%s4324_s4 + $0xf0] sm:$0xff]  ;;  %v2519_v34 = vld [vmem:[%s4324_s4 + $0xf8] sm:$0xff]  ;;  %v2790_v24 = vld [vmem:[%s4323_s3 + $0x88] sm:$0xff] }
 0x202   :  { %2404 = vmatprep.mubr.bf16.mxu0 %v1985_v36  ;;  %v3321_v32 = vpack.c.bf16 %v2501_v31, %v2500_v30  ;;  %v2502_v49 = vld [vmem:[%s4324_s4 + $0x70] sm:$0xff]  ;;  %v3323_v35 = vpack.c.bf16 %v2519_v34, %v2518_v33  ;;  %v2503_v36 = vld [vmem:[%s4324_s4 + $0x78] sm:$0xff]  ;;  %v3331_v9 = vpack.c.bf16 %v2790_v24, %v2789_v22  ;;  %v2774_v28 = vld [vmem:[%s4323_s3 + $0x8] sm:$0xff] }
 0x203   :  { %2405 = vmatmul.mubr.bf16.vlgmr.msra.gmra.mrb[4].mxu0 %v1984_v39  ;;  %3318 = vmatpush3.bf16.msra.mxu1 %v3317_v27  ;;  %v3325_v37 = vpack.c.bf16 %v2503_v36, %v2502_v49  ;;  %v2773_v27 = vld [vmem:[%s4323_s3] sm:$0xff]  ;;  %v2792_v30 = vld [vmem:[%s4323_s3 + $0x98] sm:$0xff] }
 0x204   :  { %2414 = vmatpush1.bf16.msra.mxu0 %v3835_v38  ;;  %2445 = vmatprep.mubr.bf16.mxu0 %v1987_v25  ;;  %v3333_v29 = vpack.c.bf16 %v2774_v28, %v2773_v27  ;;  %v2776_v33 = vld [vmem:[%s4323_s3 + $0x18] sm:$0xff]  ;;  %v2793_v49 = vld [vmem:[%s4323_s3 + $0xa0] sm:$0xff] }
 0x205   :  { %2415 = vmatprep.subr.bf16.mxu0 %v3840_v40  ;;  %3320 = vmatprep.subr.bf16.mxu1 %v3319_v23  ;;  %v2791_v23 = vld [vmem:[%s4323_s3 + $0x90] sm:$0xff] }
 0x206   :  { %v3335_v31 = vpack.c.bf16 %v2792_v30, %v2791_v23  ;;  %v3221_v23 = vld [vmem:[%s4325_s5 + $0x20] ss:$8 sm:$0x3] }
 0x207   :  { %3322 = vmatpush3.bf16.msra.mxu1 %v3321_v32  ;;  %v2775_v32 = vld [vmem:[%s4323_s3 + $0x10] sm:$0xff] }
 0x208   :  { %2416 = vmatpush1.bf16.msra.mxu0 %v3838_v26  ;;  %3324 = vmatprep.subr.bf16.mxu1 %v3323_v35  ;;  %v3337_v34 = vpack.c.bf16 %v2776_v33, %v2775_v32  ;;  %v2794_v35 = vld [vmem:[%s4323_s3 + $0xa8] sm:$0xff]  ;;  %v2715_v32 = vsub.s32 1, %v4037_v43 }
 0x209   :  { %2417 = vmatprep.subr.bf16.mxu0 %v3843_v41  ;;  %v3339_v36 = vpack.c.bf16 %v2794_v35, %v2793_v49 }
 0x20b   :  { %3326 = vmatpush3.bf16.msra.mxu1 %v3325_v37  ;;  %v2777_v37 = vld [vmem:[%s4323_s3 + $0x20] sm:$0xff] }
 0x20c   :  { %2418 = vmatpush1.bf16.msra.mxu0 %v3841_v42  ;;  %3328 = vmatprep.subr.bf16.mxu1 %v3327_v13 }
 0x20d   :  { %2419 = vmatprep.subr.bf16.mxu0 %v3846_v44 }
 0x210   :  { %2420 = vmatpush1.bf16.msra.mxu0 %v3844_v45 }
 0x211   :  { %2421 = vmatprep.subr.bf16.mxu0 %v3849_v46 }
 0x214   :  { %2422 = vmatpush1.bf16.msra.mxu0 %v3847_v47 }
 0x215   :  { %2423 = vmatprep.subr.bf16.mxu0 %v3852_v48 }
 0x218   :  { %2424 = vmatpush1.bf16.msra.mxu0 %v3850_v50 }
 0x219   :  { %2425 = vmatprep.subr.bf16.mxu0 %v3855_v51 }
 0x21c   :  { %2426 = vmatpush1.bf16.msra.mxu0 %v3853_v52 }
 0x21d   :  { %2427 = vmatprep.subr.bf16.mxu0 %v3858_v53 }
 0x220   :  { %2428 = vmatpush1.bf16.msra.mxu0 %v3856_v54 }
 0x221   :  { %2429 = vmatprep.subr.bf16.mxu0 %v3861_v55 }
 0x224   :  { %2430 = vmatpush1.bf16.msra.mxu0 %v3859_v56 }
 0x225   :  { %2431 = vmatprep.subr.bf16.mxu0 %v3864_v57 }
 0x228   :  { %2432 = vmatpush1.bf16.msra.mxu0 %v3862_v58 }
 0x229   :  { %2433 = vmatprep.subr.bf16.mxu0 %v3867_v59 }
 0x22c   :  { %2434 = vmatpush1.bf16.msra.mxu0 %v3865_v60 }
 0x22d   :  { %2435 = vmatprep.subr.bf16.mxu0 %v3870_v61 }
 0x230   :  { %2436 = vmatpush1.bf16.msra.mxu0 %v3868_v62 }
 0x231   :  { %2437 = vmatprep.subr.bf16.mxu0 %v3873_v63 }
 0x234   :  { %2438 = vmatpush1.bf16.msra.mxu0 %v3871_v0 }
 0x235   :  { %2439 = vmatprep.subr.bf16.mxu0 %v3876_v1 }
 0x238   :  { %2440 = vmatpush1.bf16.msra.mxu0 %v3874_v2 }
 0x239   :  { %2441 = vmatprep.subr.bf16.mxu0 %v3879_v3 }
 0x23c   :  { %2442 = vmatpush1.bf16.msra.mxu0 %v3877_v4 }
 0x23d   :  { %2443 = vmatprep.subr.bf16.mxu0 %v3882_v5 }
 0x240   :  { %2444 = vmatpush1.bf16.msra.mxu0 %v3880_v7 }
 0x243   :  { %2446 = vmatmul.mubr.bf16.vlgmr.msra.gmra.mrb[4].mxu0 %v1986_v10 }
 0x316   :  { %v4176_v38 = vpop.f32.mrb[4].mxu0 }
 0x317   :  { %v2455_v39 = vsel %vm2454_vm4, %v4176_v38, 0.0  ;;  %v2469_v40 = vmul.f32 %v4176_v38, %v4176_v38  ;;  %v4181_v25 = vpop.f32.mrb[5].mxu0 }
 0x318   :  { %v2456_v26 = vrot.slane %v2455_v39, 4  ;;  %v2462_v41 = vsel %vm2454_vm4, %v4181_v25, 0.0  ;;  %v2470_v42 = vmul.f32 %v4181_v25, %v4181_v25  ;;  %v2451_v44 = vpop.f32.mrb[6].mxu0 }
 0x319   :  { %v2471_v45 = vsel %vm2454_vm4, %v2469_v40, 0.0  ;;  %v2463_v46 = vrot.slane %v2462_v41, 4  ;;  %v2452_v47 = vpop.f32.mrb[7].mxu0  ;;  %v2779_v44 = vld [vmem:[%s4323_s3 + $0x30] sm:$0xff] }
 0x31a   :  { %v2457_v48 = vadd.f32 %v2456_v26, %v2455_v39  ;;  %v2472_v50 = vrot.slane %v2471_v45, 4  ;;  %v2478_v51 = vsel %vm2454_vm4, %v2470_v42, 0.0  ;;  %v2778_v39 = vld [vmem:[%s4323_s3 + $0x28] sm:$0xff]  ;;  %v2795_v26 = vld [vmem:[%s4323_s3 + $0xb0] sm:$0xff]  ;;  %v2797_v47 = vld [vmem:[%s4323_s3 + $0xc0] sm:$0xff] }
 0x31b   :  { %v2464_v52 = vadd.f32 %v2463_v46, %v2462_v41  ;;  %v2479_v53 = vrot.slane %v2478_v51, 4  ;;  %v3341_v40 = vpack.c.bf16 %v2778_v39, %v2777_v37  ;;  %v2796_v41 = vld [vmem:[%s4323_s3 + $0xb8] sm:$0xff] }
 0x31c   :  { %v2458_v54 = vrot.slane %v2457_v48, 2  ;;  %v2473_v55 = vadd.f32 %v2472_v50, %v2471_v45  ;;  %v3343_v42 = vpack.c.bf16 %v2796_v41, %v2795_v26  ;;  %v2780_v45 = vld [vmem:[%s4323_s3 + $0x38] sm:$0xff]  ;;  %v3222_v41 = vld [vmem:[%s4325_s5 + $0x21] ss:$8 sm:$0x3]  ;;  %s3972_s5 = smov [#allocation7]  }
 0x31d   :  { %v2465_v56 = vrot.slane %v2464_v52, 2  ;;  %v2480_v57 = vadd.f32 %v2479_v53, %v2478_v51  ;;  %v3345_v46 = vpack.c.bf16 %v2780_v45, %v2779_v44  ;;  %v2781_v51 = vld [vmem:[%s4323_s3 + $0x40] sm:$0xff]  ;;  %s2887_s15 = sshll.u32 %s3972_s5, 4  ;;  %s2888_s15 = int_to_ptr.vmem [resolvable:$true] %s2887_s15 }
 0x31e   :  { %v2459_v58 = vadd.f32 %v2458_v54, %v2457_v48  ;;  %v2474_v59 = vrot.slane %v2473_v55, 2  ;;  %v2798_v48 = vld [vmem:[%s4323_s3 + $0xc8] sm:$0xff]  ;;  %v2799_v54 = vld [vmem:[%s4323_s3 + $0xd0] sm:$0xff]  ;;  %s3935_s16 = scalar_lea.vmem %s2888_s15, 32  ;;  %p3940_p3 = scmp.lt.s32.totalorder %s2888_s15, %s2888_s15 }
 0x31f   :  { %v2466_v60 = vadd.f32 %v2465_v56, %v2464_v52  ;;  %v2481_v61 = vrot.slane %v2480_v57, 2  ;;  %v3347_v50 = vpack.c.bf16 %v2798_v48, %v2797_v47  ;;  %v2782_v52 = vld [vmem:[%s4323_s3 + $0x48] sm:$0xff]  ;;  %p3936_p2 = scmp.ne.s32.totalorder %s2888_s15, %s3935_s16  ;;  %p3941_p4 = scmp.lt.s32.totalorder %s3935_s16, %s3935_s16 }
 0x320   :  { %v2475_v62 = vadd.f32 %v2474_v59, %v2473_v55  ;;  %v2460_v1 = vrot.slane %v2459_v58, 1  ;;  %v3349_v53 = vpack.c.bf16 %v2782_v52, %v2781_v51  ;;  %v2800_v55 = vld [vmem:[%s4323_s3 + $0xd8] sm:$0xff] }
 0x321   :  { %v2467_v63 = vrot.slane %v2466_v60, 1  ;;  %v2482_v0 = vadd.f32 %v2481_v61, %v2480_v57  ;;  %v3351_v56 = vpack.c.bf16 %v2800_v55, %v2799_v54  ;;  %v2783_v57 = vld [vmem:[%s4323_s3 + $0x50] sm:$0xff]  ;;  %v2802_v61 = vld [vmem:[%s4323_s3 + $0xe8] sm:$0xff]  ;;  %p3942_p5 = por %p3941_p4, %p3940_p3 }
 0x322   :  { %v2476_v2 = vrot.slane %v2475_v62, 1  ;;  %v2461_v7 = vadd.f32 %v2460_v1, %v2459_v58  ;;  %v2784_v58 = vld [vmem:[%s4323_s3 + $0x58] sm:$0xff]  ;;  %v2803_v1 = vld [vmem:[%s4323_s3 + $0xf0] sm:$0xff] }
 0x323   :  { %v2483_v3 = vrot.slane %v2482_v0, 1  ;;  %v2468_v5 = vadd.f32 %v2467_v63, %v2466_v60  ;;  %v3353_v59 = vpack.c.bf16 %v2784_v58, %v2783_v57  ;;  %v2801_v60 = vld [vmem:[%s4323_s3 + $0xe0] sm:$0xff]  ;;  %p3943_p6 = pnand %p3942_p5, %p3936_p2 }
 0x324   :  { %v2477_v4 = vadd.f32 %v2476_v2, %v2475_v62  ;;  %v2785_v62 = vld [vmem:[%s4323_s3 + $0x60] sm:$0xff]  ;;  %v3355_v63 = vpack.c.bf16 %v2802_v61, %v2801_v60  ;;  %v2804_v2 = vld [vmem:[%s4323_s3 + $0xf8] sm:$0xff] }
 0x325   :  { %v2484_v6 = vadd.f32 %v2483_v3, %v2482_v0  ;;  %v2786_v0 = vld [vmem:[%s4323_s3 + $0x68] sm:$0xff] }
 0x326   :  { %v2486_v10 = vsel %vm2485_vm5, %v2461_v7, %v2477_v4  ;;  %v3357_v3 = vpack.c.bf16 %v2786_v0, %v2785_v62  ;;  %v3359_v4 = vpack.c.bf16 %v2804_v2, %v2803_v1 }
 0x327   :  { %v2487_v8 = vsel %vm2485_vm5, %v2468_v5, %v2484_v6  ;;  %v2787_v5 = vld [vmem:[%s4323_s3 + $0x70] sm:$0xff]  ;;  %v2788_v6 = vld [vmem:[%s4323_s3 + $0x78] sm:$0xff] }
 0x328   :  { %2584 = vmatprep.mubr.f32.mxu1 %v2487_v8  ;;  %v3361_v7 = vpack.c.bf16 %v2788_v6, %v2787_v5 }
 0x329   :  { %2585 = vmatmul.mubr.f32.vlgmr.msra.gmra.mrb[4].mxu1 %v2486_v10 }
 0x32a   :  { %3330 = vmatpush1.bf16.msra.mxu1 %v3329_v16  ;;  %2667 = vmatprep.mubr.f32.mxu1 %v3970_v17 }
 0x32b   :  { %3332 = vmatprep.subr.bf16.mxu1 %v3331_v9 }
 0x3fc   :  { %v3257_v18 = vpop.f32.mrb[4].mxu1 }
 0x3fd   :  { %v3258_v19 = vpop.f32.mrb[5].mxu1 }
 0x3fe   :  { %v3259_v20 = vadd.f32 %v3258_v19, %v3257_v18  ;;  %v3971_v19 = vmov 1966171168  }
 0x400   :  { %v2590_v21 = vmul.f32 0.03125, %v3259_v20  ;;  %v2692_v20 = vunpack.c.l.s4 %v3971_v19 }
 0x402   :  { %3223 = vmatmul.mubr.msk.f32.vlgmr.msra.gmra.mrb[6].mxu1 %vm2599_vm6, %v2590_v21  ;;  %v2693_v21 = vunpack.c.0.s8 %v2692_v20 }
 0x403   :  { %3334 = vmatpush3.bf16.msra.mxu1 %v3333_v29 }
 0x404   :  { %3336 = vmatprep.subr.bf16.mxu1 %v3335_v31  ;;  %v2696_v24 = vsub.s32 %v2693_v21, %v4037_v43  ;;  %v2711_v31 = vsub.s32 0, %v4037_v43 }
 0x407   :  { %3338 = vmatpush3.bf16.msra.mxu1 %v3337_v34 }
 0x408   :  { %3340 = vmatprep.subr.bf16.mxu1 %v3339_v36 }
 0x40b   :  { %3342 = vmatpush3.bf16.msra.mxu1 %v3341_v40 }
 0x40c   :  { %3344 = vmatprep.subr.bf16.mxu1 %v3343_v42 }
 0x40f   :  { %3346 = vmatpush3.bf16.msra.mxu1 %v3345_v46 }
 0x410   :  { %3348 = vmatprep.subr.bf16.mxu1 %v3347_v50 }
 0x413   :  { %3350 = vmatpush3.bf16.msra.mxu1 %v3349_v53 }
 0x414   :  { %3352 = vmatprep.subr.bf16.mxu1 %v3351_v56 }
 0x417   :  { %3354 = vmatpush3.bf16.msra.mxu1 %v3353_v59 }
 0x418   :  { %3356 = vmatprep.subr.bf16.mxu1 %v3355_v63 }
 0x41b   :  { %3358 = vmatpush3.bf16.msra.mxu1 %v3357_v3 }
 0x41c   :  { %3360 = vmatprep.subr.bf16.mxu1 %v3359_v4 }
 0x41f   :  { %3362 = vmatpush3.bf16.msra.mxu1 %v3361_v7 }
 0x4d5   :  { %v2669_v8 = vpop.f32.mrb[6].mxu1 }
 0x4d6   :  { %v2674_v10 = vmul.f32 %v2669_v8, %v2669_v8  ;;  %v2671_v11 = vpop.f32.mrb[7].mxu1 }
 0x4d7   :  { %v2675_v12 = vmul.f32 %v2671_v11, %v2671_v11 }
 0x4d8   :  { %v2678_v13 = vrot.slane %v2674_v10, 7 }
 0x4d9   :  { %v2679_v14 = vrot.slane %v2675_v12, 7 }
 0x4da   :  { %v2682_v15 = vsub.f32 %v2669_v8, %v2678_v13 }
 0x4db   :  { %v2683_v16 = vsub.f32 %v2671_v11, %v2679_v14 }
 0x4dc   :  { %v2684_v17 = vadd.f32 1e-05, %v2682_v15 }
 0x4dd   :  { %v2685_v18 = vadd.f32 1e-05, %v2683_v16 }
 0x4de   :  { %3883 = vrsqrt.f32 %v2684_v17 }
 0x4df   :  { %3885 = vrsqrt.f32 %v2685_v18 }
 0x4e8   :  { %v3884_v22 = vpop.eup %3883 }
 0x4e9   :  { %v3886_v9 = vpop.eup %3885 }
 0x4ea   :  { %v2690_v27 = vcombine.low %v3884_v22, %v3886_v9 }
 0x4ec   :  { %v2697_v28 = vrot.slane %v2690_v27, %v2696_v24 }
 0x4ee   :  { %v2698_v29 = vcombine.high %v2697_v28, %v2697_v28 }
 0x4f0   :  { %v2705_v30 = vrot.slane %v2698_v29, %v2696_v24 }
 0x4f2   :  { %v2707_v33 = vmul.f32 %v3221_v23, %v2705_v30 }
 0x4f4   :  { %v2712_v34 = vrot.slane %v2707_v33, %v2711_v31  ;;  %v2716_v49 = vrot.slane %v2707_v33, %v2715_v32 }
 0x4f6   :  { %v2720_v35 = vmul.f32 %v2716_v49, %v4181_v25  ;;  %v2721_v36 = vmul.f32 %v2712_v34, %v2669_v8  ;;  %v2722_v37 = vmul.f32 %v2716_v49, %v2671_v11  ;;  %v2719_v39 = vmul.f32 %v2712_v34, %v4176_v38 }
 0x4f8   :  { %v2725_v40 = vcombine.low %v2721_v36, %v2722_v37 }
 0x4fa   :  { %v2732_v26 = vrot.slane %v2725_v40, %v2696_v24 }
 0x4fc   :  { %v2739_v42 = vrot.slane %v2732_v26, %v2696_v24 }
 0x4fe   :  { %v2741_v44 = vsub.f32 %v3222_v41, %v2739_v42 }
 0x500   :  { %v2746_v45 = vrot.slane %v2741_v44, %v2711_v31  ;;  %v2750_v46 = vrot.slane %v2741_v44, %v2715_v32 }
 0x502   :  { %v2753_v43 = vadd.f32 %v2746_v45, %v2719_v39  ;;  %v2754_v47 = vadd.f32 %v2750_v46, %v2720_v35 }
 0x504   :  { %vm2755_vm7 = vcmp.ge.f32.partialorder %v2753_v43, 0.0  ;;  %vm2756_vm8 = vcmp.ge.f32.partialorder %v2754_v47, 0.0  ;;  %v2757_v48 = vmul.f32 0.2, %v2753_v43  ;;  %v2758_v25 = vmul.f32 0.2, %v2754_v47 }
 0x506   :  { %v2759_v50 = vsel %vm2755_vm7, %v2753_v43, %v2757_v48  ;;  %v2760_v51 = vsel %vm2756_vm8, %v2754_v47, %v2758_v25 }
 0x507   :  { %v2763_v52 = vcombine.low %v2759_v50, %v2760_v51  ;;  %2869 = vmatprep.mubr.f32.mxu1 %v2760_v51 }
 0x508   :  { %2870 = vmatmul.mubr.f32.vlgmr.msra.gmra.mrb[8].mxu1 %v2759_v50 }
 0x509   :  { %3224 = vst.sshfl [vmem:[%s4327_s7] sm:$0x33 pattern:$0x76325410] %v2763_v52 }
 0x5db   :  { %v3292_v38 = vpop.f32.mrb[8].mxu1 }
 0x5dc   :  { %v3293_v53 = vpop.f32.mrb[9].mxu1 }
 0x5dd   :  { %v3294_v54 = vadd.f32 %v3293_v53, %v3292_v38 }
 0x5df   :  { %v2875_v55 = vsub.f32 0.0, %v3294_v54 }
 0x5e1   :  { %v2876_v56 = vmul.f32 1.442695, %v2875_v55 }
 0x5e3   :  { %3887 = vpow2.f32 %v2876_v56 }
 0x5ed   :  { %v3888_v57 = vpop.eup %3887 }
 0x5ee   :  { %v2878_v58 = vadd.f32 1.0, %v3888_v57 }
 0x5f0   :  { %3889 = vrcp.f32 %v2878_v58 }
 0x5fa   :  { %v3890_v59 = vpop.eup %3889 }
 0x5fb   :  { %2880 = vst [vmem:[#allocation7] sm:$0x3] %v3890_v59 }
 0x5fc   :  { %3946 = shalt.err (!%p3943_p6)
}
 0x5fd   :  { %s3947_s18 = scalar_lea.hbm %s4326_s6, 32 }
 0x5fe   :  { %p3948_p7 = scmp.ne.s32.totalorder %s4326_s6, %s3947_s18  ;;  %p3951_p8 = scmp.lt.u32.totalorder %s3947_s18, %s4326_s6 }
 0x600   :  { %p3953_p9 = pnand %p3951_p8, %p3948_p7 }
 0x602   :  { %3956 = shalt.err (!%p3953_p9)
}
 0x603   :  { %2890 = dma.vmem_to_hbm [thread:$0]  %s2888_s15, 32, %s4326_s6, [#allocation4]  }
 0x604   :  { %3961 = dma.done.wait [#allocation4], 32  }
 0x605   :  { %3962 = vsyncadd [#allocation4], 4294967264 }
 0x606   :  { %2898 = vsyncpa [#allocation3], 1 }
 0x607   :  { %2899 = vsyncpa [#allocation6], 1 }
 0x608   :  { %2900 = vsyncpa [#allocation4], 1 }

</bundles_post_ra>
